<compile_context>
chip_gen: v7x
topology: tpu7x:2x2x1
jax: 0.10.0
libtpu: 0.0.40
codegen_flags: <defaults>
</compile_context>

<pallas_src>
import jax
import jax.numpy as jnp
from jax.experimental import pallas as pl
from jax.experimental.pallas import tpu as pltpu

# --- synthetic "model config" (stands in for the HF config) ---
VOCAB = 97
VOCAB_PAD = 128      # token-embedding table padded once (at init) to a lane-aligned size
MAX_LEN = 8          # tokenizer max_length -> seq
HIDDEN = 128         # hidden_size
N_HEADS = 4
HEAD_DIM = HIDDEN // N_HEADS
FFN = 256
N_LAYERS = 2
LN_EPS = 1e-5
NEG_BIAS = -1e9


def _layer_norm(x, g, b):
    mu = jnp.mean(x, axis=-1, keepdims=True)
    var = jnp.mean((x - mu) ** 2, axis=-1, keepdims=True)
    return (x - mu) * jax.lax.rsqrt(var + LN_EPS) * g + b


# ----------------------------- fused Pallas kernel -----------------------------

def txt_encoder_kernel(ids_ref, mask_ref, tok_ref, pos_ref,
                       ln1g_ref, ln1b_ref, wqkv_ref, wo_ref,
                       ln2g_ref, ln2b_ref, w1_ref, b1_ref, w2_ref, b2_ref,
                       lnfg_ref, lnfb_ref, o_ref):
    """One sequence per grid step: embedding + N_LAYERS pre-LN layers + final LN."""
    _, L, H = o_ref.shape
    NH, HD = N_HEADS, HEAD_DIM

    # --- embedding: one-hot MXU matmul gather + positional add; activation stays [L, H] ---
    ids = ids_ref[...]                                                    # [L, 1] int32
    classes = jax.lax.broadcasted_iota(jnp.int32, (L, VOCAB_PAD), 1)      # [L, VOCAB_PAD]
    onehot = (ids == classes).astype(jnp.float32)                         # exact 0/1
    x = jnp.dot(onehot, tok_ref[...],
                preferred_element_type=jnp.float32) + pos_ref[...]        # [L, H]

    # per-sequence key-padding additive bias, broadcast over heads and query rows
    bias = (1.0 - mask_ref[...]) * NEG_BIAS                               # [1, 1, L]
    scale = 1.0 / (HD ** 0.5)

    for layer in range(N_LAYERS):                                         # unrolled (N_LAYERS=2)
        # --- multi-head self-attention ---
        xn = _layer_norm(x, ln1g_ref[layer], ln1b_ref[layer])             # [L, H]
        # single lane-dense QKV matmul: q | k | v each a 128-lane-aligned column block
        qkv = jnp.dot(xn, wqkv_ref[layer],
                      preferred_element_type=jnp.float32)                 # [L, 3*H]
        # head split via static lane slices (copy work only, no per-head matmuls)
        q = jnp.stack([qkv[:, h * HD:(h + 1) * HD] for h in range(NH)])           # [NH, L, HD]
        k = jnp.stack([qkv[:, H + h * HD:H + (h + 1) * HD] for h in range(NH)])
        v = jnp.stack([qkv[:, 2 * H + h * HD:2 * H + (h + 1) * HD] for h in range(NH)])

        # batched scores (transpose folded into dot_general), one softmax for all heads
        s = jnp.einsum('hqd,hkd->hqk', q, k,
                       preferred_element_type=jnp.float32) * scale + bias  # [NH, L, L]
        p = jax.nn.softmax(s, axis=-1)
        ctx = jnp.einsum('hqk,hkd->hqd', p, v,
                         preferred_element_type=jnp.float32)               # [NH, L, HD]

        # head-merge to a single [L, H] slab, then ONE [L,H]@[H,H] output projection
        ctx2d = jnp.concatenate([ctx[h] for h in range(NH)], axis=-1)      # [L, H]
        x = x + jnp.dot(ctx2d, wo_ref[layer], preferred_element_type=jnp.float32)

        # --- GELU MLP ---
        xn2 = _layer_norm(x, ln2g_ref[layer], ln2b_ref[layer])
        ff = jnp.dot(xn2, w1_ref[layer], preferred_element_type=jnp.float32) + b1_ref[layer]
        ff = jax.nn.gelu(ff)
        x = x + jnp.dot(ff, w2_ref[layer], preferred_element_type=jnp.float32) + b2_ref[layer]

    # --- final LayerNorm epilogue (T5-style encoder last_hidden_state) ---
    x = _layer_norm(x, lnfg_ref[...], lnfb_ref[...])
    o_ref[...] = x[None, :, :]


# ----------------------------- packing (called ONCE, outside jit) -----------------------------

def pack_params(params):
    """Stack per-layer weights into kernel-friendly layouts. Call once at init."""
    layers = params["layers"]
    tok = jnp.zeros((VOCAB_PAD, HIDDEN), jnp.float32).at[:VOCAB].set(params["tok_emb"])
    # q | k | v concatenated along columns -> [H, 3*H]; each block is 128-lane aligned and
    # head-major within the block (matches the reference reshape(L, NH, HD) ordering).
    wqkv = jnp.stack([jnp.concatenate([lp["wq"], lp["wk"], lp["wv"]], axis=1)
                      for lp in layers])                                   # [NL, H, 3*H]
    return {
        "tok_emb": tok,                                                    # [VOCAB_PAD, H]
        "pos_emb": params["pos_emb"],                                      # [L, H]
        "ln1_g": jnp.stack([lp["ln1_g"] for lp in layers]),                # [NL, 1, H]
        "ln1_b": jnp.stack([lp["ln1_b"] for lp in layers]),
        "wqkv": wqkv,
        "wo": jnp.stack([lp["wo"] for lp in layers]),                      # [NL, H, H]
        "ln2_g": jnp.stack([lp["ln2_g"] for lp in layers]),
        "ln2_b": jnp.stack([lp["ln2_b"] for lp in layers]),
        "w1": jnp.stack([lp["w1"] for lp in layers]),                      # [NL, H, FFN]
        "b1": jnp.stack([lp["b1"] for lp in layers]),                      # [NL, 1, FFN]
        "w2": jnp.stack([lp["w2"] for lp in layers]),                      # [NL, FFN, H]
        "b2": jnp.stack([lp["b2"] for lp in layers]),                      # [NL, 1, H]
        "final_ln_g": params["final_ln_g"],                                # [1, H]
        "final_ln_b": params["final_ln_b"],
    }


def _const_spec(shape):
    """Full-array block with a constant index map: stays VMEM-resident across grid steps."""
    n = len(shape)
    return pl.BlockSpec(tuple(int(d) for d in shape), lambda b, _n=n: (0,) * _n)


# ----------------------------- forward wrapper -----------------------------

def txt_embedder_forward(input_ids, attention_mask, pk):
    """TxtEmbedder.forward given already-tokenized input (returns last_hidden_state)."""
    B, L = input_ids.shape
    H = HIDDEN

    ids2d = input_ids.reshape(B * L, 1).astype(jnp.int32)                  # [B*L, 1]
    mask3d = attention_mask.astype(jnp.float32).reshape(B, 1, L)           # [B, 1, L]

    weight_args = (pk["tok_emb"], pk["pos_emb"],
                   pk["ln1_g"], pk["ln1_b"], pk["wqkv"], pk["wo"],
                   pk["ln2_g"], pk["ln2_b"], pk["w1"], pk["b1"], pk["w2"], pk["b2"],
                   pk["final_ln_g"], pk["final_ln_b"])

    in_specs = ([pl.BlockSpec((L, 1), lambda b: (b, 0)),                   # per-sequence ids
                 pl.BlockSpec((1, 1, L), lambda b: (b, 0, 0))]             # per-sequence mask
                + [_const_spec(w.shape) for w in weight_args])

    return pl.pallas_call(
        txt_encoder_kernel,
        grid=(B,),                                                         # one sequence per step
        out_shape=jax.ShapeDtypeStruct((B, L, H), jnp.float32),
        in_specs=in_specs,
        out_specs=pl.BlockSpec((1, L, H), lambda b: (b, 0, 0)),
        compiler_params=pltpu.CompilerParams(dimension_semantics=("parallel",)),
    )(ids2d, mask3d, *weight_args)


# ----------------------------- tokenizer + params -----------------------------

# TODO(synk): HF string tokenization (AutoTokenizer) has no Pallas/JAX equivalent; a
# deterministic char-hash tokenizer stands in for TxtTokenizer (truncation + pad to max_length).
def simple_tokenize(texts, max_length):
    ids, mask = [], []
    for t in texts:
        toks = [(ord(c) % (VOCAB - 1)) + 1 for c in t][:max_length]
        m = [1] * len(toks) + [0] * (max_length - len(toks))
        toks = toks + [0] * (max_length - len(toks))
        ids.append(toks)
        mask.append(m)
    return jnp.array(ids, jnp.int32), jnp.array(mask, jnp.int32)


def init_params(key):
    ks = jax.random.split(key, 2 + N_LAYERS)

    def dense(kk, shape, scale=0.02):
        return (scale * jax.random.normal(kk, shape)).astype(jnp.float32)

    params = {
        "tok_emb": dense(ks[0], (VOCAB, HIDDEN)),
        "pos_emb": dense(ks[1], (MAX_LEN, HIDDEN)),
        "final_ln_g": jnp.ones((1, HIDDEN), jnp.float32),
        "final_ln_b": jnp.zeros((1, HIDDEN), jnp.float32),
        "layers": [],
    }
    for i in range(N_LAYERS):
        kk = jax.random.split(ks[2 + i], 6)
        params["layers"].append({
            "ln1_g": jnp.ones((1, HIDDEN), jnp.float32),
            "ln1_b": jnp.zeros((1, HIDDEN), jnp.float32),
            "wq": dense(kk[0], (HIDDEN, HIDDEN)),
            "wk": dense(kk[1], (HIDDEN, HIDDEN)),
            "wv": dense(kk[2], (HIDDEN, HIDDEN)),
            "wo": dense(kk[3], (HIDDEN, HIDDEN)),
            "ln2_g": jnp.ones((1, HIDDEN), jnp.float32),
            "ln2_b": jnp.zeros((1, HIDDEN), jnp.float32),
            "w1": dense(kk[4], (HIDDEN, FFN)),
            "b1": jnp.zeros((1, FFN), jnp.float32),
            "w2": dense(kk[5], (FFN, HIDDEN)),
            "b2": jnp.zeros((1, HIDDEN), jnp.float32),
        })
    return params


# ----------------------------- pure-JAX reference -----------------------------

def _ref_layer(x, mask_bias, lp):
    B, L, H = x.shape
    xn = _layer_norm(x, lp["ln1_g"], lp["ln1_b"])
    q, k, v = xn @ lp["wq"], xn @ lp["wk"], xn @ lp["wv"]

    def heads(t):
        return t.reshape(B, L, N_HEADS, HEAD_DIM).transpose(0, 2, 1, 3)

    qh, kh, vh = heads(q), heads(k), heads(v)
    s = jnp.einsum("bhqd,bhkd->bhqk", qh, kh) / (HEAD_DIM ** 0.5) + mask_bias[:, None, :, :]
    p_attn = jax.nn.softmax(s, axis=-1)
    ctx = jnp.einsum("bhqk,bhkd->bhqd", p_attn, vh).transpose(0, 2, 1, 3).reshape(B, L, H)
    x = x + ctx @ lp["wo"]
    xn2 = _layer_norm(x, lp["ln2_g"], lp["ln2_b"])
    ff = jax.nn.gelu(xn2 @ lp["w1"] + lp["b1"])
    return x + (ff @ lp["w2"] + lp["b2"])


def reference_forward(input_ids, attention_mask, params):
    x = params["tok_emb"][input_ids] + params["pos_emb"][None, :, :]
    mask_bias = (1.0 - attention_mask.astype(jnp.float32))[:, None, :] * NEG_BIAS
    for lp in params["layers"]:
        x = _ref_layer(x, mask_bias, lp)
    return _layer_norm(x, params["final_ln_g"], params["final_ln_b"])


# ----------------------------- main -----------------------------

if __name__ == "__main__":
    params = init_params(jax.random.PRNGKey(0))
    packed = pack_params(params)          # weight repack hoisted out of the jitted forward
    texts = ["a red chair next to a wooden table", "lamp"]
    input_ids, attention_mask = simple_tokenize(texts, MAX_LEN)   # [2, 8] each

    fwd = jax.jit(txt_embedder_forward)
    out = jax.block_until_ready(fwd(input_ids, attention_mask, packed))

    assert out.shape == (len(texts), MAX_LEN, HIDDEN), out.shape
    ref = reference_forward(input_ids, attention_mask, params)
    assert jnp.allclose(out, ref, rtol=2e-3, atol=2e-3), "mismatch vs JAX reference"

    print("KERNEL_OK")
</pallas_src>

<mosaic_0001>
module attributes {stable_mosaic.version = 11 : i64} {
  func.func @txt_encoder_kernel(%arg0: i32, %arg1: memref<8x1xi32, #tpu.memory_space<vmem>>, %arg2: memref<1x1x8xf32, #tpu.memory_space<vmem>>, %arg3: memref<128x128xf32, #tpu.memory_space<vmem>>, %arg4: memref<8x128xf32, #tpu.memory_space<vmem>>, %arg5: memref<2x1x128xf32, #tpu.memory_space<vmem>>, %arg6: memref<2x1x128xf32, #tpu.memory_space<vmem>>, %arg7: memref<2x128x384xf32, #tpu.memory_space<vmem>>, %arg8: memref<2x128x128xf32, #tpu.memory_space<vmem>>, %arg9: memref<2x1x128xf32, #tpu.memory_space<vmem>>, %arg10: memref<2x1x128xf32, #tpu.memory_space<vmem>>, %arg11: memref<2x128x256xf32, #tpu.memory_space<vmem>>, %arg12: memref<2x1x256xf32, #tpu.memory_space<vmem>>, %arg13: memref<2x256x128xf32, #tpu.memory_space<vmem>>, %arg14: memref<2x1x128xf32, #tpu.memory_space<vmem>>, %arg15: memref<1x128xf32, #tpu.memory_space<vmem>>, %arg16: memref<1x128xf32, #tpu.memory_space<vmem>>, %arg17: memref<1x8x128xf32, #tpu.memory_space<vmem>>) attributes {dimension_semantics = [#tpu.dimension_semantics<parallel>], iteration_bounds = array<i64: 2>, scalar_prefetch = 0 : i64, scratch_operands = 0 : i64, tpu.core_type = #tpu.core_type<tc>, window_params = [{transform_indices = @transform_0, window_bounds = array<i64: 8, 1>}, {transform_indices = @transform_1, window_bounds = array<i64: 1, 1, 8>}, {pipeline_mode = #tpu.pipeline_mode<synchronous>, transform_indices = @transform_2, window_bounds = array<i64: 128, 128>}, {pipeline_mode = #tpu.pipeline_mode<synchronous>, transform_indices = @transform_3, window_bounds = array<i64: 8, 128>}, {pipeline_mode = #tpu.pipeline_mode<synchronous>, transform_indices = @transform_4, window_bounds = array<i64: 2, 1, 128>}, {pipeline_mode = #tpu.pipeline_mode<synchronous>, transform_indices = @transform_5, window_bounds = array<i64: 2, 1, 128>}, {pipeline_mode = #tpu.pipeline_mode<synchronous>, transform_indices = @transform_6, window_bounds = array<i64: 2, 128, 384>}, {pipeline_mode = #tpu.pipeline_mode<synchronous>, transform_indices = @transform_7, window_bounds = array<i64: 2, 128, 128>}, {pipeline_mode = #tpu.pipeline_mode<synchronous>, transform_indices = @transform_8, window_bounds = array<i64: 2, 1, 128>}, {pipeline_mode = #tpu.pipeline_mode<synchronous>, transform_indices = @transform_9, window_bounds = array<i64: 2, 1, 128>}, {pipeline_mode = #tpu.pipeline_mode<synchronous>, transform_indices = @transform_10, window_bounds = array<i64: 2, 128, 256>}, {pipeline_mode = #tpu.pipeline_mode<synchronous>, transform_indices = @transform_11, window_bounds = array<i64: 2, 1, 256>}, {pipeline_mode = #tpu.pipeline_mode<synchronous>, transform_indices = @transform_12, window_bounds = array<i64: 2, 256, 128>}, {pipeline_mode = #tpu.pipeline_mode<synchronous>, transform_indices = @transform_13, window_bounds = array<i64: 2, 1, 128>}, {pipeline_mode = #tpu.pipeline_mode<synchronous>, transform_indices = @transform_14, window_bounds = array<i64: 1, 128>}, {pipeline_mode = #tpu.pipeline_mode<synchronous>, transform_indices = @transform_15, window_bounds = array<i64: 1, 128>}, {transform_indices = @transform_16, window_bounds = array<i64: 1, 8, 128>}]} {
    %c0 = arith.constant 0 : index
    %c0_0 = arith.constant 0 : index
    %0 = vector.load %arg1[%c0, %c0_0] : memref<8x1xi32, #tpu.memory_space<vmem>>, vector<8x1xi32>
    %1 = tpu.iota {dimensions = array<i32: 1>} : vector<8x128xi32>
    %2 = vector.broadcast %0 : vector<8x1xi32> to vector<8x128xi32>
    %3 = arith.cmpi eq, %2, %1 : vector<8x128xi32>
    %4 = arith.extui %3 : vector<8x128xi1> to vector<8x128xi32>
    %5 = arith.sitofp %4 : vector<8x128xi32> to vector<8x128xf32>
    %c0_1 = arith.constant 0 : index
    %c0_2 = arith.constant 0 : index
    %6 = vector.load %arg3[%c0_1, %c0_2] : memref<128x128xf32, #tpu.memory_space<vmem>>, vector<128x128xf32>
    %cst = arith.constant dense<0.000000e+00> : vector<8x128xf32>
    %7 = tpu.matmul %5, %6, %cst {dimension_numbers = #tpu.dot_dimension_numbers<[1], [0], [0], [1], [0, 0, 1, 1], [], []>} : vector<8x128xf32>, vector<128x128xf32>, vector<8x128xf32> -> vector<8x128xf32>
    %c0_3 = arith.constant 0 : index
    %c0_4 = arith.constant 0 : index
    %8 = vector.load %arg4[%c0_3, %c0_4] : memref<8x128xf32, #tpu.memory_space<vmem>>, vector<8x128xf32>
    %9 = arith.addf %7, %8 : vector<8x128xf32>
    %c0_5 = arith.constant 0 : index
    %c0_6 = arith.constant 0 : index
    %c0_7 = arith.constant 0 : index
    %10 = vector.load %arg2[%c0_5, %c0_6, %c0_7] : memref<1x1x8xf32, #tpu.memory_space<vmem>>, vector<1x1x8xf32>
    %cst_8 = arith.constant 1.000000e+00 : f32
    %11 = vector.broadcast %cst_8 : f32 to vector<1x1x8xf32>
    %12 = arith.subf %11, %10 : vector<1x1x8xf32>
    %cst_9 = arith.constant -1.000000e+09 : f32
    %13 = vector.broadcast %cst_9 : f32 to vector<1x1x8xf32>
    %14 = arith.mulf %12, %13 : vector<1x1x8xf32>
    %c0_10 = arith.constant 0 : index
    %c0_11 = arith.constant 0 : index
    %c0_12 = arith.constant 0 : index
    %15 = vector.load %arg5[%c0_10, %c0_11, %c0_12] : memref<2x1x128xf32, #tpu.memory_space<vmem>>, vector<1x1x128xf32>
    %16 = vector.shape_cast %15 : vector<1x1x128xf32> to vector<1x128xf32>
    %c0_13 = arith.constant 0 : index
    %c0_14 = arith.constant 0 : index
    %c0_15 = arith.constant 0 : index
    %17 = vector.load %arg6[%c0_13, %c0_14, %c0_15] : memref<2x1x128xf32, #tpu.memory_space<vmem>>, vector<1x1x128xf32>
    %18 = vector.shape_cast %17 : vector<1x1x128xf32> to vector<1x128xf32>
    %cst_16 = arith.constant dense<0.000000e+00> : vector<8xf32>
    %19 = vector.multi_reduction <add>, %9, %cst_16 [1] : vector<8x128xf32> to vector<8xf32>
    %20 = vector.shape_cast %19 : vector<8xf32> to vector<8x1xf32>
    %cst_17 = arith.constant 1.280000e+02 : f32
    %21 = vector.broadcast %cst_17 : f32 to vector<8x1xf32>
    %22 = arith.divf %20, %21 : vector<8x1xf32>
    %23 = vector.broadcast %22 : vector<8x1xf32> to vector<8x128xf32>
    %24 = arith.subf %9, %23 : vector<8x128xf32>
    %25 = arith.mulf %24, %24 : vector<8x128xf32>
    %cst_18 = arith.constant dense<0.000000e+00> : vector<8xf32>
    %26 = vector.multi_reduction <add>, %25, %cst_18 [1] : vector<8x128xf32> to vector<8xf32>
    %27 = vector.shape_cast %26 : vector<8xf32> to vector<8x1xf32>
    %cst_19 = arith.constant 1.280000e+02 : f32
    %28 = vector.broadcast %cst_19 : f32 to vector<8x1xf32>
    %29 = arith.divf %27, %28 : vector<8x1xf32>
    %30 = vector.broadcast %22 : vector<8x1xf32> to vector<8x128xf32>
    %31 = arith.subf %9, %30 : vector<8x128xf32>
    %cst_20 = arith.constant 9.99999974E-6 : f32
    %32 = vector.broadcast %cst_20 : f32 to vector<8x1xf32>
    %33 = arith.addf %29, %32 : vector<8x1xf32>
    %34 = math.rsqrt %33 : vector<8x1xf32>
    %35 = vector.broadcast %34 : vector<8x1xf32> to vector<8x128xf32>
    %36 = arith.mulf %31, %35 : vector<8x128xf32>
    %37 = vector.broadcast %16 : vector<1x128xf32> to vector<8x128xf32>
    %38 = arith.mulf %36, %37 : vector<8x128xf32>
    %39 = vector.broadcast %18 : vector<1x128xf32> to vector<8x128xf32>
    %40 = arith.addf %38, %39 : vector<8x128xf32>
    %c0_21 = arith.constant 0 : index
    %c0_22 = arith.constant 0 : index
    %c0_23 = arith.constant 0 : index
    %41 = vector.load %arg7[%c0_21, %c0_22, %c0_23] : memref<2x128x384xf32, #tpu.memory_space<vmem>>, vector<1x128x384xf32>
    %42 = vector.shape_cast %41 : vector<1x128x384xf32> to vector<128x384xf32>
    %cst_24 = arith.constant dense<0.000000e+00> : vector<8x384xf32>
    %43 = tpu.matmul %40, %42, %cst_24 {dimension_numbers = #tpu.dot_dimension_numbers<[1], [0], [0], [1], [0, 0, 1, 1], [], []>} : vector<8x128xf32>, vector<128x384xf32>, vector<8x384xf32> -> vector<8x384xf32>
    %44 = vector.extract_strided_slice %43 {offsets = [0, 0], sizes = [8, 32], strides = [1, 1]} : vector<8x384xf32> to vector<8x32xf32>
    %45 = vector.extract_strided_slice %43 {offsets = [0, 32], sizes = [8, 32], strides = [1, 1]} : vector<8x384xf32> to vector<8x32xf32>
    %46 = vector.extract_strided_slice %43 {offsets = [0, 64], sizes = [8, 32], strides = [1, 1]} : vector<8x384xf32> to vector<8x32xf32>
    %47 = vector.extract_strided_slice %43 {offsets = [0, 96], sizes = [8, 32], strides = [1, 1]} : vector<8x384xf32> to vector<8x32xf32>
    %48 = vector.shape_cast %44 : vector<8x32xf32> to vector<1x8x32xf32>
    %49 = vector.shape_cast %45 : vector<8x32xf32> to vector<1x8x32xf32>
    %50 = vector.shape_cast %46 : vector<8x32xf32> to vector<1x8x32xf32>
    %51 = vector.shape_cast %47 : vector<8x32xf32> to vector<1x8x32xf32>
    %52 = tpu.concatenate %48, %49, %50, %51 in 0 : vector<1x8x32xf32>, vector<1x8x32xf32>, vector<1x8x32xf32>, vector<1x8x32xf32> -> vector<4x8x32xf32>
    %53 = vector.extract_strided_slice %43 {offsets = [0, 128], sizes = [8, 32], strides = [1, 1]} : vector<8x384xf32> to vector<8x32xf32>
    %54 = vector.extract_strided_slice %43 {offsets = [0, 160], sizes = [8, 32], strides = [1, 1]} : vector<8x384xf32> to vector<8x32xf32>
    %55 = vector.extract_strided_slice %43 {offsets = [0, 192], sizes = [8, 32], strides = [1, 1]} : vector<8x384xf32> to vector<8x32xf32>
    %56 = vector.extract_strided_slice %43 {offsets = [0, 224], sizes = [8, 32], strides = [1, 1]} : vector<8x384xf32> to vector<8x32xf32>
    %57 = vector.shape_cast %53 : vector<8x32xf32> to vector<1x8x32xf32>
    %58 = vector.shape_cast %54 : vector<8x32xf32> to vector<1x8x32xf32>
    %59 = vector.shape_cast %55 : vector<8x32xf32> to vector<1x8x32xf32>
    %60 = vector.shape_cast %56 : vector<8x32xf32> to vector<1x8x32xf32>
    %61 = tpu.concatenate %57, %58, %59, %60 in 0 : vector<1x8x32xf32>, vector<1x8x32xf32>, vector<1x8x32xf32>, vector<1x8x32xf32> -> vector<4x8x32xf32>
    %62 = vector.extract_strided_slice %43 {offsets = [0, 256], sizes = [8, 32], strides = [1, 1]} : vector<8x384xf32> to vector<8x32xf32>
    %63 = vector.extract_strided_slice %43 {offsets = [0, 288], sizes = [8, 32], strides = [1, 1]} : vector<8x384xf32> to vector<8x32xf32>
    %64 = vector.extract_strided_slice %43 {offsets = [0, 320], sizes = [8, 32], strides = [1, 1]} : vector<8x384xf32> to vector<8x32xf32>
    %65 = vector.extract_strided_slice %43 {offsets = [0, 352], sizes = [8, 32], strides = [1, 1]} : vector<8x384xf32> to vector<8x32xf32>
    %66 = vector.shape_cast %62 : vector<8x32xf32> to vector<1x8x32xf32>
    %67 = vector.shape_cast %63 : vector<8x32xf32> to vector<1x8x32xf32>
    %68 = vector.shape_cast %64 : vector<8x32xf32> to vector<1x8x32xf32>
    %69 = vector.shape_cast %65 : vector<8x32xf32> to vector<1x8x32xf32>
    %70 = tpu.concatenate %66, %67, %68, %69 in 0 : vector<1x8x32xf32>, vector<1x8x32xf32>, vector<1x8x32xf32>, vector<1x8x32xf32> -> vector<4x8x32xf32>
    "tpu.trace_start"() <{level = 10 : i32, message = "hqd,hkd->hqk"}> : () -> ()
    %cst_25 = arith.constant dense<0.000000e+00> : vector<4x8x8xf32>
    %71 = tpu.matmul %52, %61, %cst_25 {dimension_numbers = #tpu.dot_dimension_numbers<[2], [2], [1], [1], [0, 0, 0, 1, 1, 1], [0], [0]>} : vector<4x8x32xf32>, vector<4x8x32xf32>, vector<4x8x8xf32> -> vector<4x8x8xf32>
    "tpu.trace_stop"() : () -> ()
    %cst_26 = arith.constant 0.176776692 : f32
    %72 = vector.broadcast %cst_26 : f32 to vector<4x8x8xf32>
    %73 = arith.mulf %71, %72 : vector<4x8x8xf32>
    %74 = vector.broadcast %14 : vector<1x1x8xf32> to vector<4x8x8xf32>
    %75 = arith.addf %73, %74 : vector<4x8x8xf32>
    %cst_27 = arith.constant dense<0xFF800000> : vector<4x8xf32>
    %76 = vector.multi_reduction <maximumf>, %75, %cst_27 [2] : vector<4x8x8xf32> to vector<4x8xf32>
    %cst_28 = arith.constant 0xFF800000 : f32
    %77 = vector.broadcast %cst_28 : f32 to vector<4x8xf32>
    %78 = arith.maximumf %77, %76 : vector<4x8xf32>
    %79 = vector.shape_cast %78 : vector<4x8xf32> to vector<4x8x1xf32>
    %80 = vector.broadcast %79 : vector<4x8x1xf32> to vector<4x8x8xf32>
    %81 = arith.subf %75, %80 : vector<4x8x8xf32>
    %82 = math.exp %81 : vector<4x8x8xf32>
    %cst_29 = arith.constant dense<0.000000e+00> : vector<4x8xf32>
    %83 = vector.multi_reduction <add>, %82, %cst_29 [2] : vector<4x8x8xf32> to vector<4x8xf32>
    %84 = vector.shape_cast %83 : vector<4x8xf32> to vector<4x8x1xf32>
    %85 = vector.broadcast %84 : vector<4x8x1xf32> to vector<4x8x8xf32>
    %86 = arith.divf %82, %85 : vector<4x8x8xf32>
    "tpu.trace_start"() <{level = 10 : i32, message = "hqk,hkd->hqd"}> : () -> ()
    %cst_30 = arith.constant dense<0.000000e+00> : vector<4x8x32xf32>
    %87 = tpu.matmul %86, %70, %cst_30 {dimension_numbers = #tpu.dot_dimension_numbers<[2], [1], [1], [2], [0, 0, 0, 1, 1, 2], [0], [0]>} : vector<4x8x8xf32>, vector<4x8x32xf32>, vector<4x8x32xf32> -> vector<4x8x32xf32>
    "tpu.trace_stop"() : () -> ()
    %88 = vector.extract_strided_slice %87 {offsets = [0, 0, 0], sizes = [1, 8, 32], strides = [1, 1, 1]} : vector<4x8x32xf32> to vector<1x8x32xf32>
    %89 = vector.shape_cast %88 : vector<1x8x32xf32> to vector<8x32xf32>
    %90 = vector.extract_strided_slice %87 {offsets = [1, 0, 0], sizes = [1, 8, 32], strides = [1, 1, 1]} : vector<4x8x32xf32> to vector<1x8x32xf32>
    %91 = vector.shape_cast %90 : vector<1x8x32xf32> to vector<8x32xf32>
    %92 = vector.extract_strided_slice %87 {offsets = [2, 0, 0], sizes = [1, 8, 32], strides = [1, 1, 1]} : vector<4x8x32xf32> to vector<1x8x32xf32>
    %93 = vector.shape_cast %92 : vector<1x8x32xf32> to vector<8x32xf32>
    %94 = vector.extract_strided_slice %87 {offsets = [3, 0, 0], sizes = [1, 8, 32], strides = [1, 1, 1]} : vector<4x8x32xf32> to vector<1x8x32xf32>
    %95 = vector.shape_cast %94 : vector<1x8x32xf32> to vector<8x32xf32>
    %96 = tpu.concatenate %89, %91, %93, %95 in 1 : vector<8x32xf32>, vector<8x32xf32>, vector<8x32xf32>, vector<8x32xf32> -> vector<8x128xf32>
    %c0_31 = arith.constant 0 : index
    %c0_32 = arith.constant 0 : index
    %c0_33 = arith.constant 0 : index
    %97 = vector.load %arg8[%c0_31, %c0_32, %c0_33] : memref<2x128x128xf32, #tpu.memory_space<vmem>>, vector<1x128x128xf32>
    %98 = vector.shape_cast %97 : vector<1x128x128xf32> to vector<128x128xf32>
    %cst_34 = arith.constant dense<0.000000e+00> : vector<8x128xf32>
    %99 = tpu.matmul %96, %98, %cst_34 {dimension_numbers = #tpu.dot_dimension_numbers<[1], [0], [0], [1], [0, 0, 1, 1], [], []>} : vector<8x128xf32>, vector<128x128xf32>, vector<8x128xf32> -> vector<8x128xf32>
    %100 = arith.addf %9, %99 : vector<8x128xf32>
    %c0_35 = arith.constant 0 : index
    %c0_36 = arith.constant 0 : index
    %c0_37 = arith.constant 0 : index
    %101 = vector.load %arg9[%c0_35, %c0_36, %c0_37] : memref<2x1x128xf32, #tpu.memory_space<vmem>>, vector<1x1x128xf32>
    %102 = vector.shape_cast %101 : vector<1x1x128xf32> to vector<1x128xf32>
    %c0_38 = arith.constant 0 : index
    %c0_39 = arith.constant 0 : index
    %c0_40 = arith.constant 0 : index
    %103 = vector.load %arg10[%c0_38, %c0_39, %c0_40] : memref<2x1x128xf32, #tpu.memory_space<vmem>>, vector<1x1x128xf32>
    %104 = vector.shape_cast %103 : vector<1x1x128xf32> to vector<1x128xf32>
    %cst_41 = arith.constant dense<0.000000e+00> : vector<8xf32>
    %105 = vector.multi_reduction <add>, %100, %cst_41 [1] : vector<8x128xf32> to vector<8xf32>
    %106 = vector.shape_cast %105 : vector<8xf32> to vector<8x1xf32>
    %cst_42 = arith.constant 1.280000e+02 : f32
    %107 = vector.broadcast %cst_42 : f32 to vector<8x1xf32>
    %108 = arith.divf %106, %107 : vector<8x1xf32>
    %109 = vector.broadcast %108 : vector<8x1xf32> to vector<8x128xf32>
    %110 = arith.subf %100, %109 : vector<8x128xf32>
    %111 = arith.mulf %110, %110 : vector<8x128xf32>
    %cst_43 = arith.constant dense<0.000000e+00> : vector<8xf32>
    %112 = vector.multi_reduction <add>, %111, %cst_43 [1] : vector<8x128xf32> to vector<8xf32>
    %113 = vector.shape_cast %112 : vector<8xf32> to vector<8x1xf32>
    %cst_44 = arith.constant 1.280000e+02 : f32
    %114 = vector.broadcast %cst_44 : f32 to vector<8x1xf32>
    %115 = arith.divf %113, %114 : vector<8x1xf32>
    %116 = vector.broadcast %108 : vector<8x1xf32> to vector<8x128xf32>
    %117 = arith.subf %100, %116 : vector<8x128xf32>
    %cst_45 = arith.constant 9.99999974E-6 : f32
    %118 = vector.broadcast %cst_45 : f32 to vector<8x1xf32>
    %119 = arith.addf %115, %118 : vector<8x1xf32>
    %120 = math.rsqrt %119 : vector<8x1xf32>
    %121 = vector.broadcast %120 : vector<8x1xf32> to vector<8x128xf32>
    %122 = arith.mulf %117, %121 : vector<8x128xf32>
    %123 = vector.broadcast %102 : vector<1x128xf32> to vector<8x128xf32>
    %124 = arith.mulf %122, %123 : vector<8x128xf32>
    %125 = vector.broadcast %104 : vector<1x128xf32> to vector<8x128xf32>
    %126 = arith.addf %124, %125 : vector<8x128xf32>
    %c0_46 = arith.constant 0 : index
    %c0_47 = arith.constant 0 : index
    %c0_48 = arith.constant 0 : index
    %127 = vector.load %arg11[%c0_46, %c0_47, %c0_48] : memref<2x128x256xf32, #tpu.memory_space<vmem>>, vector<1x128x256xf32>
    %128 = vector.shape_cast %127 : vector<1x128x256xf32> to vector<128x256xf32>
    %cst_49 = arith.constant dense<0.000000e+00> : vector<8x256xf32>
    %129 = tpu.matmul %126, %128, %cst_49 {dimension_numbers = #tpu.dot_dimension_numbers<[1], [0], [0], [1], [0, 0, 1, 1], [], []>} : vector<8x128xf32>, vector<128x256xf32>, vector<8x256xf32> -> vector<8x256xf32>
    %c0_50 = arith.constant 0 : index
    %c0_51 = arith.constant 0 : index
    %c0_52 = arith.constant 0 : index
    %130 = vector.load %arg12[%c0_50, %c0_51, %c0_52] : memref<2x1x256xf32, #tpu.memory_space<vmem>>, vector<1x1x256xf32>
    %131 = vector.shape_cast %130 : vector<1x1x256xf32> to vector<1x256xf32>
    %132 = vector.broadcast %131 : vector<1x256xf32> to vector<8x256xf32>
    %133 = arith.addf %129, %132 : vector<8x256xf32>
    %134 = arith.mulf %133, %133 : vector<8x256xf32>
    %135 = arith.mulf %133, %134 : vector<8x256xf32>
    %cst_53 = arith.constant 4.471500e-02 : f32
    %136 = vector.broadcast %cst_53 : f32 to vector<8x256xf32>
    %137 = arith.mulf %136, %135 : vector<8x256xf32>
    %138 = arith.addf %133, %137 : vector<8x256xf32>
    %cst_54 = arith.constant 0.797884583 : f32
    %139 = vector.broadcast %cst_54 : f32 to vector<8x256xf32>
    %140 = arith.mulf %139, %138 : vector<8x256xf32>
    %141 = math.tanh %140 : vector<8x256xf32>
    %cst_55 = arith.constant 1.000000e+00 : f32
    %142 = vector.broadcast %cst_55 : f32 to vector<8x256xf32>
    %143 = arith.addf %142, %141 : vector<8x256xf32>
    %cst_56 = arith.constant 5.000000e-01 : f32
    %144 = vector.broadcast %cst_56 : f32 to vector<8x256xf32>
    %145 = arith.mulf %144, %143 : vector<8x256xf32>
    %146 = arith.mulf %133, %145 : vector<8x256xf32>
    %c0_57 = arith.constant 0 : index
    %c0_58 = arith.constant 0 : index
    %c0_59 = arith.constant 0 : index
    %147 = vector.load %arg13[%c0_57, %c0_58, %c0_59] : memref<2x256x128xf32, #tpu.memory_space<vmem>>, vector<1x256x128xf32>
    %148 = vector.shape_cast %147 : vector<1x256x128xf32> to vector<256x128xf32>
    %cst_60 = arith.constant dense<0.000000e+00> : vector<8x128xf32>
    %149 = tpu.matmul %146, %148, %cst_60 {dimension_numbers = #tpu.dot_dimension_numbers<[1], [0], [0], [1], [0, 0, 1, 1], [], []>} : vector<8x256xf32>, vector<256x128xf32>, vector<8x128xf32> -> vector<8x128xf32>
    %150 = arith.addf %100, %149 : vector<8x128xf32>
    %c0_61 = arith.constant 0 : index
    %c0_62 = arith.constant 0 : index
    %c0_63 = arith.constant 0 : index
    %151 = vector.load %arg14[%c0_61, %c0_62, %c0_63] : memref<2x1x128xf32, #tpu.memory_space<vmem>>, vector<1x1x128xf32>
    %152 = vector.shape_cast %151 : vector<1x1x128xf32> to vector<1x128xf32>
    %153 = vector.broadcast %152 : vector<1x128xf32> to vector<8x128xf32>
    %154 = arith.addf %150, %153 : vector<8x128xf32>
    %c1 = arith.constant 1 : index
    %c0_64 = arith.constant 0 : index
    %c0_65 = arith.constant 0 : index
    %155 = vector.load %arg5[%c1, %c0_64, %c0_65] : memref<2x1x128xf32, #tpu.memory_space<vmem>>, vector<1x1x128xf32>
    %156 = vector.shape_cast %155 : vector<1x1x128xf32> to vector<1x128xf32>
    %c1_66 = arith.constant 1 : index
    %c0_67 = arith.constant 0 : index
    %c0_68 = arith.constant 0 : index
    %157 = vector.load %arg6[%c1_66, %c0_67, %c0_68] : memref<2x1x128xf32, #tpu.memory_space<vmem>>, vector<1x1x128xf32>
    %158 = vector.shape_cast %157 : vector<1x1x128xf32> to vector<1x128xf32>
    %cst_69 = arith.constant dense<0.000000e+00> : vector<8xf32>
    %159 = vector.multi_reduction <add>, %154, %cst_69 [1] : vector<8x128xf32> to vector<8xf32>
    %160 = vector.shape_cast %159 : vector<8xf32> to vector<8x1xf32>
    %cst_70 = arith.constant 1.280000e+02 : f32
    %161 = vector.broadcast %cst_70 : f32 to vector<8x1xf32>
    %162 = arith.divf %160, %161 : vector<8x1xf32>
    %163 = vector.broadcast %162 : vector<8x1xf32> to vector<8x128xf32>
    %164 = arith.subf %154, %163 : vector<8x128xf32>
    %165 = arith.mulf %164, %164 : vector<8x128xf32>
    %cst_71 = arith.constant dense<0.000000e+00> : vector<8xf32>
    %166 = vector.multi_reduction <add>, %165, %cst_71 [1] : vector<8x128xf32> to vector<8xf32>
    %167 = vector.shape_cast %166 : vector<8xf32> to vector<8x1xf32>
    %cst_72 = arith.constant 1.280000e+02 : f32
    %168 = vector.broadcast %cst_72 : f32 to vector<8x1xf32>
    %169 = arith.divf %167, %168 : vector<8x1xf32>
    %170 = vector.broadcast %162 : vector<8x1xf32> to vector<8x128xf32>
    %171 = arith.subf %154, %170 : vector<8x128xf32>
    %cst_73 = arith.constant 9.99999974E-6 : f32
    %172 = vector.broadcast %cst_73 : f32 to vector<8x1xf32>
    %173 = arith.addf %169, %172 : vector<8x1xf32>
    %174 = math.rsqrt %173 : vector<8x1xf32>
    %175 = vector.broadcast %174 : vector<8x1xf32> to vector<8x128xf32>
    %176 = arith.mulf %171, %175 : vector<8x128xf32>
    %177 = vector.broadcast %156 : vector<1x128xf32> to vector<8x128xf32>
    %178 = arith.mulf %176, %177 : vector<8x128xf32>
    %179 = vector.broadcast %158 : vector<1x128xf32> to vector<8x128xf32>
    %180 = arith.addf %178, %179 : vector<8x128xf32>
    %c1_74 = arith.constant 1 : index
    %c0_75 = arith.constant 0 : index
    %c0_76 = arith.constant 0 : index
    %181 = vector.load %arg7[%c1_74, %c0_75, %c0_76] : memref<2x128x384xf32, #tpu.memory_space<vmem>>, vector<1x128x384xf32>
    %182 = vector.shape_cast %181 : vector<1x128x384xf32> to vector<128x384xf32>
    %cst_77 = arith.constant dense<0.000000e+00> : vector<8x384xf32>
    %183 = tpu.matmul %180, %182, %cst_77 {dimension_numbers = #tpu.dot_dimension_numbers<[1], [0], [0], [1], [0, 0, 1, 1], [], []>} : vector<8x128xf32>, vector<128x384xf32>, vector<8x384xf32> -> vector<8x384xf32>
    %184 = vector.extract_strided_slice %183 {offsets = [0, 0], sizes = [8, 32], strides = [1, 1]} : vector<8x384xf32> to vector<8x32xf32>
    %185 = vector.extract_strided_slice %183 {offsets = [0, 32], sizes = [8, 32], strides = [1, 1]} : vector<8x384xf32> to vector<8x32xf32>
    %186 = vector.extract_strided_slice %183 {offsets = [0, 64], sizes = [8, 32], strides = [1, 1]} : vector<8x384xf32> to vector<8x32xf32>
    %187 = vector.extract_strided_slice %183 {offsets = [0, 96], sizes = [8, 32], strides = [1, 1]} : vector<8x384xf32> to vector<8x32xf32>
    %188 = vector.shape_cast %184 : vector<8x32xf32> to vector<1x8x32xf32>
    %189 = vector.shape_cast %185 : vector<8x32xf32> to vector<1x8x32xf32>
    %190 = vector.shape_cast %186 : vector<8x32xf32> to vector<1x8x32xf32>
    %191 = vector.shape_cast %187 : vector<8x32xf32> to vector<1x8x32xf32>
    %192 = tpu.concatenate %188, %189, %190, %191 in 0 : vector<1x8x32xf32>, vector<1x8x32xf32>, vector<1x8x32xf32>, vector<1x8x32xf32> -> vector<4x8x32xf32>
    %193 = vector.extract_strided_slice %183 {offsets = [0, 128], sizes = [8, 32], strides = [1, 1]} : vector<8x384xf32> to vector<8x32xf32>
    %194 = vector.extract_strided_slice %183 {offsets = [0, 160], sizes = [8, 32], strides = [1, 1]} : vector<8x384xf32> to vector<8x32xf32>
    %195 = vector.extract_strided_slice %183 {offsets = [0, 192], sizes = [8, 32], strides = [1, 1]} : vector<8x384xf32> to vector<8x32xf32>
    %196 = vector.extract_strided_slice %183 {offsets = [0, 224], sizes = [8, 32], strides = [1, 1]} : vector<8x384xf32> to vector<8x32xf32>
    %197 = vector.shape_cast %193 : vector<8x32xf32> to vector<1x8x32xf32>
    %198 = vector.shape_cast %194 : vector<8x32xf32> to vector<1x8x32xf32>
    %199 = vector.shape_cast %195 : vector<8x32xf32> to vector<1x8x32xf32>
    %200 = vector.shape_cast %196 : vector<8x32xf32> to vector<1x8x32xf32>
    %201 = tpu.concatenate %197, %198, %199, %200 in 0 : vector<1x8x32xf32>, vector<1x8x32xf32>, vector<1x8x32xf32>, vector<1x8x32xf32> -> vector<4x8x32xf32>
    %202 = vector.extract_strided_slice %183 {offsets = [0, 256], sizes = [8, 32], strides = [1, 1]} : vector<8x384xf32> to vector<8x32xf32>
    %203 = vector.extract_strided_slice %183 {offsets = [0, 288], sizes = [8, 32], strides = [1, 1]} : vector<8x384xf32> to vector<8x32xf32>
    %204 = vector.extract_strided_slice %183 {offsets = [0, 320], sizes = [8, 32], strides = [1, 1]} : vector<8x384xf32> to vector<8x32xf32>
    %205 = vector.extract_strided_slice %183 {offsets = [0, 352], sizes = [8, 32], strides = [1, 1]} : vector<8x384xf32> to vector<8x32xf32>
    %206 = vector.shape_cast %202 : vector<8x32xf32> to vector<1x8x32xf32>
    %207 = vector.shape_cast %203 : vector<8x32xf32> to vector<1x8x32xf32>
    %208 = vector.shape_cast %204 : vector<8x32xf32> to vector<1x8x32xf32>
    %209 = vector.shape_cast %205 : vector<8x32xf32> to vector<1x8x32xf32>
    %210 = tpu.concatenate %206, %207, %208, %209 in 0 : vector<1x8x32xf32>, vector<1x8x32xf32>, vector<1x8x32xf32>, vector<1x8x32xf32> -> vector<4x8x32xf32>
    "tpu.trace_start"() <{level = 10 : i32, message = "hqd,hkd->hqk"}> : () -> ()
    %cst_78 = arith.constant dense<0.000000e+00> : vector<4x8x8xf32>
    %211 = tpu.matmul %192, %201, %cst_78 {dimension_numbers = #tpu.dot_dimension_numbers<[2], [2], [1], [1], [0, 0, 0, 1, 1, 1], [0], [0]>} : vector<4x8x32xf32>, vector<4x8x32xf32>, vector<4x8x8xf32> -> vector<4x8x8xf32>
    "tpu.trace_stop"() : () -> ()
    %cst_79 = arith.constant 0.176776692 : f32
    %212 = vector.broadcast %cst_79 : f32 to vector<4x8x8xf32>
    %213 = arith.mulf %211, %212 : vector<4x8x8xf32>
    %214 = vector.broadcast %14 : vector<1x1x8xf32> to vector<4x8x8xf32>
    %215 = arith.addf %213, %214 : vector<4x8x8xf32>
    %cst_80 = arith.constant dense<0xFF800000> : vector<4x8xf32>
    %216 = vector.multi_reduction <maximumf>, %215, %cst_80 [2] : vector<4x8x8xf32> to vector<4x8xf32>
    %cst_81 = arith.constant 0xFF800000 : f32
    %217 = vector.broadcast %cst_81 : f32 to vector<4x8xf32>
    %218 = arith.maximumf %217, %216 : vector<4x8xf32>
    %219 = vector.shape_cast %218 : vector<4x8xf32> to vector<4x8x1xf32>
    %220 = vector.broadcast %219 : vector<4x8x1xf32> to vector<4x8x8xf32>
    %221 = arith.subf %215, %220 : vector<4x8x8xf32>
    %222 = math.exp %221 : vector<4x8x8xf32>
    %cst_82 = arith.constant dense<0.000000e+00> : vector<4x8xf32>
    %223 = vector.multi_reduction <add>, %222, %cst_82 [2] : vector<4x8x8xf32> to vector<4x8xf32>
    %224 = vector.shape_cast %223 : vector<4x8xf32> to vector<4x8x1xf32>
    %225 = vector.broadcast %224 : vector<4x8x1xf32> to vector<4x8x8xf32>
    %226 = arith.divf %222, %225 : vector<4x8x8xf32>
    "tpu.trace_start"() <{level = 10 : i32, message = "hqk,hkd->hqd"}> : () -> ()
    %cst_83 = arith.constant dense<0.000000e+00> : vector<4x8x32xf32>
    %227 = tpu.matmul %226, %210, %cst_83 {dimension_numbers = #tpu.dot_dimension_numbers<[2], [1], [1], [2], [0, 0, 0, 1, 1, 2], [0], [0]>} : vector<4x8x8xf32>, vector<4x8x32xf32>, vector<4x8x32xf32> -> vector<4x8x32xf32>
    "tpu.trace_stop"() : () -> ()
    %228 = vector.extract_strided_slice %227 {offsets = [0, 0, 0], sizes = [1, 8, 32], strides = [1, 1, 1]} : vector<4x8x32xf32> to vector<1x8x32xf32>
    %229 = vector.shape_cast %228 : vector<1x8x32xf32> to vector<8x32xf32>
    %230 = vector.extract_strided_slice %227 {offsets = [1, 0, 0], sizes = [1, 8, 32], strides = [1, 1, 1]} : vector<4x8x32xf32> to vector<1x8x32xf32>
    %231 = vector.shape_cast %230 : vector<1x8x32xf32> to vector<8x32xf32>
    %232 = vector.extract_strided_slice %227 {offsets = [2, 0, 0], sizes = [1, 8, 32], strides = [1, 1, 1]} : vector<4x8x32xf32> to vector<1x8x32xf32>
    %233 = vector.shape_cast %232 : vector<1x8x32xf32> to vector<8x32xf32>
    %234 = vector.extract_strided_slice %227 {offsets = [3, 0, 0], sizes = [1, 8, 32], strides = [1, 1, 1]} : vector<4x8x32xf32> to vector<1x8x32xf32>
    %235 = vector.shape_cast %234 : vector<1x8x32xf32> to vector<8x32xf32>
    %236 = tpu.concatenate %229, %231, %233, %235 in 1 : vector<8x32xf32>, vector<8x32xf32>, vector<8x32xf32>, vector<8x32xf32> -> vector<8x128xf32>
    %c1_84 = arith.constant 1 : index
    %c0_85 = arith.constant 0 : index
    %c0_86 = arith.constant 0 : index
    %237 = vector.load %arg8[%c1_84, %c0_85, %c0_86] : memref<2x128x128xf32, #tpu.memory_space<vmem>>, vector<1x128x128xf32>
    %238 = vector.shape_cast %237 : vector<1x128x128xf32> to vector<128x128xf32>
    %cst_87 = arith.constant dense<0.000000e+00> : vector<8x128xf32>
    %239 = tpu.matmul %236, %238, %cst_87 {dimension_numbers = #tpu.dot_dimension_numbers<[1], [0], [0], [1], [0, 0, 1, 1], [], []>} : vector<8x128xf32>, vector<128x128xf32>, vector<8x128xf32> -> vector<8x128xf32>
    %240 = arith.addf %154, %239 : vector<8x128xf32>
    %c1_88 = arith.constant 1 : index
    %c0_89 = arith.constant 0 : index
    %c0_90 = arith.constant 0 : index
    %241 = vector.load %arg9[%c1_88, %c0_89, %c0_90] : memref<2x1x128xf32, #tpu.memory_space<vmem>>, vector<1x1x128xf32>
    %242 = vector.shape_cast %241 : vector<1x1x128xf32> to vector<1x128xf32>
    %c1_91 = arith.constant 1 : index
    %c0_92 = arith.constant 0 : index
    %c0_93 = arith.constant 0 : index
    %243 = vector.load %arg10[%c1_91, %c0_92, %c0_93] : memref<2x1x128xf32, #tpu.memory_space<vmem>>, vector<1x1x128xf32>
    %244 = vector.shape_cast %243 : vector<1x1x128xf32> to vector<1x128xf32>
    %cst_94 = arith.constant dense<0.000000e+00> : vector<8xf32>
    %245 = vector.multi_reduction <add>, %240, %cst_94 [1] : vector<8x128xf32> to vector<8xf32>
    %246 = vector.shape_cast %245 : vector<8xf32> to vector<8x1xf32>
    %cst_95 = arith.constant 1.280000e+02 : f32
    %247 = vector.broadcast %cst_95 : f32 to vector<8x1xf32>
    %248 = arith.divf %246, %247 : vector<8x1xf32>
    %249 = vector.broadcast %248 : vector<8x1xf32> to vector<8x128xf32>
    %250 = arith.subf %240, %249 : vector<8x128xf32>
    %251 = arith.mulf %250, %250 : vector<8x128xf32>
    %cst_96 = arith.constant dense<0.000000e+00> : vector<8xf32>
    %252 = vector.multi_reduction <add>, %251, %cst_96 [1] : vector<8x128xf32> to vector<8xf32>
    %253 = vector.shape_cast %252 : vector<8xf32> to vector<8x1xf32>
    %cst_97 = arith.constant 1.280000e+02 : f32
    %254 = vector.broadcast %cst_97 : f32 to vector<8x1xf32>
    %255 = arith.divf %253, %254 : vector<8x1xf32>
    %256 = vector.broadcast %248 : vector<8x1xf32> to vector<8x128xf32>
    %257 = arith.subf %240, %256 : vector<8x128xf32>
    %cst_98 = arith.constant 9.99999974E-6 : f32
    %258 = vector.broadcast %cst_98 : f32 to vector<8x1xf32>
    %259 = arith.addf %255, %258 : vector<8x1xf32>
    %260 = math.rsqrt %259 : vector<8x1xf32>
    %261 = vector.broadcast %260 : vector<8x1xf32> to vector<8x128xf32>
    %262 = arith.mulf %257, %261 : vector<8x128xf32>
    %263 = vector.broadcast %242 : vector<1x128xf32> to vector<8x128xf32>
    %264 = arith.mulf %262, %263 : vector<8x128xf32>
    %265 = vector.broadcast %244 : vector<1x128xf32> to vector<8x128xf32>
    %266 = arith.addf %264, %265 : vector<8x128xf32>
    %c1_99 = arith.constant 1 : index
    %c0_100 = arith.constant 0 : index
    %c0_101 = arith.constant 0 : index
    %267 = vector.load %arg11[%c1_99, %c0_100, %c0_101] : memref<2x128x256xf32, #tpu.memory_space<vmem>>, vector<1x128x256xf32>
    %268 = vector.shape_cast %267 : vector<1x128x256xf32> to vector<128x256xf32>
    %cst_102 = arith.constant dense<0.000000e+00> : vector<8x256xf32>
    %269 = tpu.matmul %266, %268, %cst_102 {dimension_numbers = #tpu.dot_dimension_numbers<[1], [0], [0], [1], [0, 0, 1, 1], [], []>} : vector<8x128xf32>, vector<128x256xf32>, vector<8x256xf32> -> vector<8x256xf32>
    %c1_103 = arith.constant 1 : index
    %c0_104 = arith.constant 0 : index
    %c0_105 = arith.constant 0 : index
    %270 = vector.load %arg12[%c1_103, %c0_104, %c0_105] : memref<2x1x256xf32, #tpu.memory_space<vmem>>, vector<1x1x256xf32>
    %271 = vector.shape_cast %270 : vector<1x1x256xf32> to vector<1x256xf32>
    %272 = vector.broadcast %271 : vector<1x256xf32> to vector<8x256xf32>
    %273 = arith.addf %269, %272 : vector<8x256xf32>
    %274 = arith.mulf %273, %273 : vector<8x256xf32>
    %275 = arith.mulf %273, %274 : vector<8x256xf32>
    %cst_106 = arith.constant 4.471500e-02 : f32
    %276 = vector.broadcast %cst_106 : f32 to vector<8x256xf32>
    %277 = arith.mulf %276, %275 : vector<8x256xf32>
    %278 = arith.addf %273, %277 : vector<8x256xf32>
    %cst_107 = arith.constant 0.797884583 : f32
    %279 = vector.broadcast %cst_107 : f32 to vector<8x256xf32>
    %280 = arith.mulf %279, %278 : vector<8x256xf32>
    %281 = math.tanh %280 : vector<8x256xf32>
    %cst_108 = arith.constant 1.000000e+00 : f32
    %282 = vector.broadcast %cst_108 : f32 to vector<8x256xf32>
    %283 = arith.addf %282, %281 : vector<8x256xf32>
    %cst_109 = arith.constant 5.000000e-01 : f32
    %284 = vector.broadcast %cst_109 : f32 to vector<8x256xf32>
    %285 = arith.mulf %284, %283 : vector<8x256xf32>
    %286 = arith.mulf %273, %285 : vector<8x256xf32>
    %c1_110 = arith.constant 1 : index
    %c0_111 = arith.constant 0 : index
    %c0_112 = arith.constant 0 : index
    %287 = vector.load %arg13[%c1_110, %c0_111, %c0_112] : memref<2x256x128xf32, #tpu.memory_space<vmem>>, vector<1x256x128xf32>
    %288 = vector.shape_cast %287 : vector<1x256x128xf32> to vector<256x128xf32>
    %cst_113 = arith.constant dense<0.000000e+00> : vector<8x128xf32>
    %289 = tpu.matmul %286, %288, %cst_113 {dimension_numbers = #tpu.dot_dimension_numbers<[1], [0], [0], [1], [0, 0, 1, 1], [], []>} : vector<8x256xf32>, vector<256x128xf32>, vector<8x128xf32> -> vector<8x128xf32>
    %290 = arith.addf %240, %289 : vector<8x128xf32>
    %c1_114 = arith.constant 1 : index
    %c0_115 = arith.constant 0 : index
    %c0_116 = arith.constant 0 : index
    %291 = vector.load %arg14[%c1_114, %c0_115, %c0_116] : memref<2x1x128xf32, #tpu.memory_space<vmem>>, vector<1x1x128xf32>
    %292 = vector.shape_cast %291 : vector<1x1x128xf32> to vector<1x128xf32>
    %293 = vector.broadcast %292 : vector<1x128xf32> to vector<8x128xf32>
    %294 = arith.addf %290, %293 : vector<8x128xf32>
    %c0_117 = arith.constant 0 : index
    %c0_118 = arith.constant 0 : index
    %295 = vector.load %arg15[%c0_117, %c0_118] : memref<1x128xf32, #tpu.memory_space<vmem>>, vector<1x128xf32>
    %c0_119 = arith.constant 0 : index
    %c0_120 = arith.constant 0 : index
    %296 = vector.load %arg16[%c0_119, %c0_120] : memref<1x128xf32, #tpu.memory_space<vmem>>, vector<1x128xf32>
    %cst_121 = arith.constant dense<0.000000e+00> : vector<8xf32>
    %297 = vector.multi_reduction <add>, %294, %cst_121 [1] : vector<8x128xf32> to vector<8xf32>
    %298 = vector.shape_cast %297 : vector<8xf32> to vector<8x1xf32>
    %cst_122 = arith.constant 1.280000e+02 : f32
    %299 = vector.broadcast %cst_122 : f32 to vector<8x1xf32>
    %300 = arith.divf %298, %299 : vector<8x1xf32>
    %301 = vector.broadcast %300 : vector<8x1xf32> to vector<8x128xf32>
    %302 = arith.subf %294, %301 : vector<8x128xf32>
    %303 = arith.mulf %302, %302 : vector<8x128xf32>
    %cst_123 = arith.constant dense<0.000000e+00> : vector<8xf32>
    %304 = vector.multi_reduction <add>, %303, %cst_123 [1] : vector<8x128xf32> to vector<8xf32>
    %305 = vector.shape_cast %304 : vector<8xf32> to vector<8x1xf32>
    %cst_124 = arith.constant 1.280000e+02 : f32
    %306 = vector.broadcast %cst_124 : f32 to vector<8x1xf32>
    %307 = arith.divf %305, %306 : vector<8x1xf32>
    %308 = vector.broadcast %300 : vector<8x1xf32> to vector<8x128xf32>
    %309 = arith.subf %294, %308 : vector<8x128xf32>
    %cst_125 = arith.constant 9.99999974E-6 : f32
    %310 = vector.broadcast %cst_125 : f32 to vector<8x1xf32>
    %311 = arith.addf %307, %310 : vector<8x1xf32>
    %312 = math.rsqrt %311 : vector<8x1xf32>
    %313 = vector.broadcast %312 : vector<8x1xf32> to vector<8x128xf32>
    %314 = arith.mulf %309, %313 : vector<8x128xf32>
    %315 = vector.broadcast %295 : vector<1x128xf32> to vector<8x128xf32>
    %316 = arith.mulf %314, %315 : vector<8x128xf32>
    %317 = vector.broadcast %296 : vector<1x128xf32> to vector<8x128xf32>
    %318 = arith.addf %316, %317 : vector<8x128xf32>
    %319 = vector.shape_cast %318 : vector<8x128xf32> to vector<1x8x128xf32>
    %c0_126 = arith.constant 0 : index
    %c0_127 = arith.constant 0 : index
    %c0_128 = arith.constant 0 : index
    %320 = vector.load %arg17[%c0_126, %c0_127, %c0_128] : memref<1x8x128xf32, #tpu.memory_space<vmem>>, vector<1x8x128xf32>
    tpu.vector_store %arg17[%c0_126, %c0_127, %c0_128], %319 {strides = array<i32>} : memref<1x8x128xf32, #tpu.memory_space<vmem>>, vector<1x8x128xf32>,
    return
  }
  func.func @transform_0(%arg0: i32) -> (i32, i32) {
    %c0_i32 = arith.constant 0 : i32
    %c0_i32_0 = arith.constant 0 : i32
    return %arg0, %c0_i32 : i32, i32
  }
  func.func @transform_1(%arg0: i32) -> (i32, i32, i32) {
    %c0_i32 = arith.constant 0 : i32
    %c0_i32_0 = arith.constant 0 : i32
    %c0_i32_1 = arith.constant 0 : i32
    return %arg0, %c0_i32, %c0_i32_0 : i32, i32, i32
  }
  func.func @transform_2(%arg0: i32) -> (i32, i32) {
    %c0_i32 = arith.constant 0 : i32
    %c0_i32_0 = arith.constant 0 : i32
    %c0_i32_1 = arith.constant 0 : i32
    return %c0_i32, %c0_i32_0 : i32, i32
  }
  func.func @transform_3(%arg0: i32) -> (i32, i32) {
    %c0_i32 = arith.constant 0 : i32
    %c0_i32_0 = arith.constant 0 : i32
    %c0_i32_1 = arith.constant 0 : i32
    return %c0_i32, %c0_i32_0 : i32, i32
  }
  func.func @transform_4(%arg0: i32) -> (i32, i32, i32) {
    %c0_i32 = arith.constant 0 : i32
    %c0_i32_0 = arith.constant 0 : i32
    %c0_i32_1 = arith.constant 0 : i32
    %c0_i32_2 = arith.constant 0 : i32
    return %c0_i32, %c0_i32_0, %c0_i32_1 : i32, i32, i32
  }
  func.func @transform_5(%arg0: i32) -> (i32, i32, i32) {
    %c0_i32 = arith.constant 0 : i32
    %c0_i32_0 = arith.constant 0 : i32
    %c0_i32_1 = arith.constant 0 : i32
    %c0_i32_2 = arith.constant 0 : i32
    return %c0_i32, %c0_i32_0, %c0_i32_1 : i32, i32, i32
  }
  func.func @transform_6(%arg0: i32) -> (i32, i32, i32) {
    %c0_i32 = arith.constant 0 : i32
    %c0_i32_0 = arith.constant 0 : i32
    %c0_i32_1 = arith.constant 0 : i32
    %c0_i32_2 = arith.constant 0 : i32
    return %c0_i32, %c0_i32_0, %c0_i32_1 : i32, i32, i32
  }
  func.func @transform_7(%arg0: i32) -> (i32, i32, i32) {
    %c0_i32 = arith.constant 0 : i32
    %c0_i32_0 = arith.constant 0 : i32
    %c0_i32_1 = arith.constant 0 : i32
    %c0_i32_2 = arith.constant 0 : i32
    return %c0_i32, %c0_i32_0, %c0_i32_1 : i32, i32, i32
  }
  func.func @transform_8(%arg0: i32) -> (i32, i32, i32) {
    %c0_i32 = arith.constant 0 : i32
    %c0_i32_0 = arith.constant 0 : i32
    %c0_i32_1 = arith.constant 0 : i32
    %c0_i32_2 = arith.constant 0 : i32
    return %c0_i32, %c0_i32_0, %c0_i32_1 : i32, i32, i32
  }
  func.func @transform_9(%arg0: i32) -> (i32, i32, i32) {
    %c0_i32 = arith.constant 0 : i32
    %c0_i32_0 = arith.constant 0 : i32
    %c0_i32_1 = arith.constant 0 : i32
    %c0_i32_2 = arith.constant 0 : i32
    return %c0_i32, %c0_i32_0, %c0_i32_1 : i32, i32, i32
  }
  func.func @transform_10(%arg0: i32) -> (i32, i32, i32) {
    %c0_i32 = arith.constant 0 : i32
    %c0_i32_0 = arith.constant 0 : i32
    %c0_i32_1 = arith.constant 0 : i32
    %c0_i32_2 = arith.constant 0 : i32
    return %c0_i32, %c0_i32_0, %c0_i32_1 : i32, i32, i32
  }
  func.func @transform_11(%arg0: i32) -> (i32, i32, i32) {
    %c0_i32 = arith.constant 0 : i32
    %c0_i32_0 = arith.constant 0 : i32
    %c0_i32_1 = arith.constant 0 : i32
    %c0_i32_2 = arith.constant 0 : i32
    return %c0_i32, %c0_i32_0, %c0_i32_1 : i32, i32, i32
  }
  func.func @transform_12(%arg0: i32) -> (i32, i32, i32) {
    %c0_i32 = arith.constant 0 : i32
    %c0_i32_0 = arith.constant 0 : i32
    %c0_i32_1 = arith.constant 0 : i32
    %c0_i32_2 = arith.constant 0 : i32
    return %c0_i32, %c0_i32_0, %c0_i32_1 : i32, i32, i32
  }
  func.func @transform_13(%arg0: i32) -> (i32, i32, i32) {
    %c0_i32 = arith.constant 0 : i32
    %c0_i32_0 = arith.constant 0 : i32
    %c0_i32_1 = arith.constant 0 : i32
    %c0_i32_2 = arith.constant 0 : i32
    return %c0_i32, %c0_i32_0, %c0_i32_1 : i32, i32, i32
  }
  func.func @transform_14(%arg0: i32) -> (i32, i32) {
    %c0_i32 = arith.constant 0 : i32
    %c0_i32_0 = arith.constant 0 : i32
    %c0_i32_1 = arith.constant 0 : i32
    return %c0_i32, %c0_i32_0 : i32, i32
  }
  func.func @transform_15(%arg0: i32) -> (i32, i32) {
    %c0_i32 = arith.constant 0 : i32
    %c0_i32_0 = arith.constant 0 : i32
    %c0_i32_1 = arith.constant 0 : i32
    return %c0_i32, %c0_i32_0 : i32, i32
  }
  func.func @transform_16(%arg0: i32) -> (i32, i32, i32) {
    %c0_i32 = arith.constant 0 : i32
    %c0_i32_0 = arith.constant 0 : i32
    %c0_i32_1 = arith.constant 0 : i32
    return %arg0, %c0_i32, %c0_i32_0 : i32, i32, i32
  }
}

</mosaic_0001>

<bundles_post_ra>
// kernel: txt_embedder_forward.1
= control target key start
LH: loop header
LB: loop body
LE: loop exit
PB: predicated region body
PF: predicated region fallthrough
CT: control target
= control target key end

     0   :  { %s5214_s0 = inlined_call_operand.vmem [shape: s32[16,1], index: 0, kind: input, shape index: {}]   ;;  %s5215_s1 = inlined_call_operand.vmem [shape: f32[2,1,8], index: 1, kind: input, shape index: {}]   ;;  %s5216_s2 = inlined_call_operand.hbm [shape: f32[128,128], index: 2, kind: input, shape index: {}]   ;;  %s5217_s3 = inlined_call_operand.vmem [shape: f32[8,128], index: 3, kind: input, shape index: {}]   ;;  %s5218_s4 = inlined_call_operand.vmem [shape: f32[2,1,128], index: 4, kind: input, shape index: {}]   ;;  %s5219_s5 = inlined_call_operand.vmem [shape: f32[2,1,128], index: 5, kind: input, shape index: {}]   ;;  %s5220_s6 = inlined_call_operand.hbm [shape: f32[2,128,384], index: 6, kind: input, shape index: {}]   ;;  %s5221_s7 = inlined_call_operand.hbm [shape: f32[2,128,128], index: 7, kind: input, shape index: {}]   ;;  %s5222_s8 = inlined_call_operand.vmem [shape: f32[2,1,128], index: 8, kind: input, shape index: {}]   ;;  %s5223_s9 = inlined_call_operand.vmem [shape: f32[2,1,128], index: 9, kind: input, shape index: {}]   ;;  %s5224_s10 = inlined_call_operand.hbm [shape: f32[2,128,256], index: 10, kind: input, shape index: {}]   ;;  %s5225_s11 = inlined_call_operand.vmem [shape: f32[2,1,256], index: 11, kind: input, shape index: {}]   ;;  %s5226_s12 = inlined_call_operand.hbm [shape: f32[2,256,128], index: 12, kind: input, shape index: {}]   ;;  %s5227_s13 = inlined_call_operand.vmem [shape: f32[2,1,128], index: 13, kind: input, shape index: {}]   ;;  %s5228_s14 = inlined_call_operand.vmem [shape: f32[1,128], index: 14, kind: input, shape index: {}]   ;;  %s5229_s15 = inlined_call_operand.vmem [shape: f32[1,128], index: 15, kind: input, shape index: {}]   ;;  %s5230_s16 = inlined_call_operand.hbm [shape: f32[2,8,128], index: 16, kind: output, shape index: {}]  }
   0x1   :  { %5244 = sst [smem:[#allocation24_spill]] %s5214_s0 }
   0x2   :  { %5245 = sst [smem:[#allocation25_spill]] %s5220_s6 }
   0x3   :  { %5246 = sst [smem:[#allocation26_spill]] %s5224_s10 }
   0x4   :  { %5247 = sst [smem:[#allocation27_spill]] %s5228_s14 }
   0x5   :  { %5248 = sst [smem:[#allocation28_spill]] %s5229_s15 }
   0x6   :  { %5249 = sst [smem:[#allocation29_spill]] %s5230_s16 }
   0x7   :  { %21 = vsyncpa [#allocation3], 0 }
   0x8   :  { %22 = vsyncpa [#allocation6], 0 }
   0x9   :  { %23 = vsyncpa [#allocation9], 0 }
   0xa   :  { %24 = vsyncpa [#allocation4], 0 }
   0xb   :  { %26 = vsyncpa [#allocation4 + $0x1], 0  ;;  %s4684_s21 = smov 0   ;;  %s4686_s22 = smov 0  }
   0xc   :  { %s4688_s23 = smov 0   ;;  %s4690_s24 = smov 0  }
   0xd LB: > { %5250 = sst [smem:[#allocation16_spill]] %s4565_s21  ;;  %s4705_s25 = sadd.s32 4294967295, %s4577_s24   ;;  %s4577_s24 = sphi %s4690_s24, %s5284_s24   ;;  %s4573_s23 = sphi %s4688_s23, %s5287_s23   ;;  %s4569_s22 = sphi %s4686_s22, %s5286_s22   ;;  %s4565_s21 = sphi %s4684_s21, %s5285_s21  }
   0xe   : > { %5251 = sst [smem:[#allocation17_spill]] %s4569_s22  ;;  %s3390_s26 = sadd.s32 4294967294, %s4577_s24  }
   0xf   : > { %5252 = sst [smem:[#allocation18_spill]] %s4573_s23  ;;  %s4709_s27 = sadd.s32 1, %s4577_s24  }
  0x10   : > { %5253 = sst [smem:[#allocation19_spill]] %s4577_s24  ;;  %s385_s28 = sadd.s32 1, %s4573_s23 }
  0x11   : > { %5254 = sst [smem:[#allocation20_spill]] %s4709_s27  ;;  %s382_s29 = ssub.s32 %s4577_s24, %s4709_s27 }
  0x12   : > { %p395_p0 = scmp.ne.s32.totalorder %s4573_s23, %s4569_s22  ;;  %p383_p1 = scmp.eq.s32.totalorder %s382_s29, 0 }
  0x13   : > { %p396_p2 = scmp.eq.s32.totalorder %s4705_s25, 1  ;;  %p401_p3 = scmp.ne.s32.totalorder %s4569_s22, %s4565_s21 }
  0x14   : > { %p402_p4 = scmp.eq.s32.totalorder %s3390_s26, 1  ;;  %p3391_p7 = scmp.ge.s32.totalorder %s4577_s24, 1 }
  0x15   : > { %s4720_s30 = scalar_select %p383_p1, %s4573_s23, %s385_s28  }
  0x16   : > { %p4722_p5 = por %p396_p2, %p395_p0  ;;  %p4726_p6 = por %p402_p4, %p401_p3 }
  0x17   : > { %5255 = sst [smem:[#allocation21_spill]] %s4720_s30  ;;  %p409_p8 = scmp.lt.s32.totalorder %s4577_s24, 3 }
  0x18   : > { %s5256_s0 = scalar_select %p4722_p5, 1, 0 }
  0x19   : > { %s5258_s17 = scalar_select %p4726_p6, 1, 0 }
  0x1a   : > { %5257 = sst [smem:[#allocation22_spill]] %s5256_s0  ;;  %p5237_p9 = scmp.eq.s32.totalorder %s4705_s25, 0 }
  0x1b   : > { %5259 = sst [smem:[#allocation23_spill]] %s5258_s17  ;;  %p4733_p10 = pnand %p3391_p7, %p409_p8 }
  0x1c   : > { %s4579_s19 = smov [#allocation5]   ;;  %s4580_s28 = smov [#allocation8]  }
  0x1d   : > { %s5260_s18 = scalar_select %p4733_p10, 1, 0 }
  0x1e   : > { %s443_s20 = sshll.u32 %s4579_s19, 4  ;;  %p4230_p11 = pneg %p4733_p10  ;;  %s444_s20 = int_to_ptr.vmem [resolvable:$true] %s443_s20 }
  0x1f   : > { %s475_s29 = sshll.u32 %s4580_s28, 4  ;;  %s5262_s6 = sld [smem:[#allocation25_spill]]  ;;  %s4745_s29 = int_to_ptr.vmem [resolvable:$true] %s475_s29 }
  0x20   : > { %p4741_p12 = pnand %p5237_p9, %p4230_p11 }
  0x22   : > { %p4755_p0 = pneg %p4741_p12 }
  0x25   : > { %s4363_s27 = scalar_lea.hbm %s5262_s6, 12288 }
  0x26   : > { %p4364_p13 = scmp.ne.s32.totalorder %s5262_s6, %s4363_s27  ;;  %p4370_p3 = scmp.lt.u32.totalorder %s4363_s27, %s5262_s6 }
  0x28   : > { %p4366_p1 = pnand %p4755_p0, %p4364_p13 }
  0x2a   : > { %p4367_p2 = pneg %p4366_p1 }
  0x2c   : > { %p4372_p4 = pnand %p4370_p3, %p4367_p2 }
  0x2e   : > { %4375 = shalt.err (!%p4372_p4)
}
  0x2f   : > { %s4376_s23 = scalar_lea.vmem %s444_s20, 12288  ;;  %p4384_p9 = scmp.lt.s32.totalorder %s444_s20, %s444_s20 }
  0x30   : > { %p4377_p7 = scmp.ne.s32.totalorder %s444_s20, %s4376_s23  ;;  %p4385_p6 = scmp.lt.s32.totalorder %s4376_s23, %s4376_s23 }
  0x32   : > { %p4379_p8 = pnand %p4377_p7, %p4755_p0  ;;  %p4386_p5 = por %p4385_p6, %p4384_p9 }
  0x34   : > { %p4380_p11 = pneg %p4379_p8 }
  0x36   : > { %p4387_p10 = pnand %p4386_p5, %p4380_p11 }
  0x38   : > { %4390 = shalt.err (!%p4387_p10)
}
  0x39   : > { %s4581_s21 = smov 384   ;;  %s4582_s30 = smov 24  }
  0x3a   : > { %4236 = dma.hbm_to_vmem [thread:$0]  (!%p4741_p12), %s5262_s6, 12288, %s444_s20, [#allocation6], %s4581_s21, %s4581_s21, %s4582_s30  }
  0x3b   : > { %s5264_s10 = sld [smem:[#allocation26_spill]] }
  0x41   : > { %s4391_s16 = scalar_lea.hbm %s5264_s10, 8192 }
  0x42   : > { %p4392_p13 = scmp.ne.s32.totalorder %s5264_s10, %s4391_s16  ;;  %p4398_p9 = scmp.lt.u32.totalorder %s4391_s16, %s5264_s10 }
  0x44   : > { %p4394_p5 = pnand %p4392_p13, %p4755_p0 }
  0x46   : > { %p4395_p6 = pneg %p4394_p5 }
  0x48   : > { %p4400_p10 = pnand %p4398_p9, %p4395_p6 }
  0x4a   : > { %4403 = shalt.err (!%p4400_p10)
}
  0x4b   : > { %s4404_s20 = scalar_lea.vmem %s4745_s29, 8192  ;;  %p4412_p4 = scmp.lt.s32.totalorder %s4745_s29, %s4745_s29 }
  0x4c   : > { %p4405_p1 = scmp.ne.s32.totalorder %s4745_s29, %s4404_s20  ;;  %p4413_p7 = scmp.lt.s32.totalorder %s4404_s20, %s4404_s20 }
  0x4e   : > { %p4407_p2 = pnand %p4405_p1, %p4755_p0  ;;  %p4414_p8 = por %p4413_p7, %p4412_p4 }
  0x50   : > { %p4408_p3 = pneg %p4407_p2 }
  0x52   : > { %p4415_p11 = pnand %p4414_p8, %p4408_p3 }
  0x54   : > { %4418 = shalt.err (!%p4415_p11)
}
  0x55   : > { %s4583_s14 = smov 256   ;;  %s4584_s15 = smov 16  }
  0x56   : > { %4242 = dma.hbm_to_vmem [thread:$0]  (!%p4741_p12), %s5264_s10, 8192, %s4745_s29, [#allocation9], %s4583_s14, %s4583_s14, %s4584_s15  }
  0x57   : > { %s4585_s21 = smov [#allocation2]   ;;  %s4419_s17 = scalar_lea.hbm %s5216_s2, 2048 }
  0x58   : > { %s421_s30 = sshll.u32 %s4585_s21, 4  ;;  %p4420_p13 = scmp.ne.s32.totalorder %s5216_s2, %s4419_s17  ;;  %s422_s30 = int_to_ptr.vmem [resolvable:$true] %s421_s30 }
  0x59   : > { %p4426_p9 = scmp.lt.u32.totalorder %s4419_s17, %s5216_s2 }
  0x5a   : > { %p4422_p5 = pnand %p4420_p13, %p4755_p0 }
  0x5c   : > { %p4423_p6 = pneg %p4422_p5 }
  0x5e   : > { %p4428_p10 = pnand %p4426_p9, %p4423_p6 }
  0x60   : > { %4431 = shalt.err (!%p4428_p10)
}
  0x61   : > { %s4432_s29 = scalar_lea.vmem %s422_s30, 2048  ;;  %p4440_p4 = scmp.lt.s32.totalorder %s422_s30, %s422_s30 }
  0x62   : > { %p4433_p1 = scmp.ne.s32.totalorder %s422_s30, %s4432_s29  ;;  %p4441_p7 = scmp.lt.s32.totalorder %s4432_s29, %s4432_s29 }
  0x64   : > { %p4435_p2 = pnand %p4433_p1, %p4755_p0  ;;  %p4442_p8 = por %p4441_p7, %p4440_p4 }
  0x66   : > { %p4436_p3 = pneg %p4435_p2 }
  0x68   : > { %p4443_p11 = pnand %p4442_p8, %p4436_p3 }
  0x6a   : > { %4446 = shalt.err (!%p4443_p11)
}
  0x6b   : > { %s4586_s14 = smov 128   ;;  %s4587_s15 = smov 8  }
  0x6c   : > { %4233 = dma.hbm_to_vmem [thread:$0]  (!%p4741_p12), %s5216_s2, 2048, %s422_s30, [#allocation3], %s4586_s14, %s4586_s14, %s4587_s15  }
  0x6d   : > { %s4588_s0 = smov [#allocation7]   ;;  %s4589_s24 = smov [#allocation10]  }
  0x6e   : > { %s456_s21 = sshll.u32 %s4588_s0, 4  ;;  %s491_s27 = sshll.u32 %s4589_s24, 4  ;;  %s457_s21 = int_to_ptr.vmem [resolvable:$true] %s456_s21  ;;  %s492_s27 = int_to_ptr.vmem [resolvable:$true] %s491_s27 }
  0x6f   : > { %s4447_s23 = scalar_lea.hbm %s5221_s7, 4096 }
  0x70   : > { %p4448_p13 = scmp.ne.s32.totalorder %s5221_s7, %s4447_s23  ;;  %p4454_p9 = scmp.lt.u32.totalorder %s4447_s23, %s5221_s7 }
  0x72   : > { %p4450_p5 = pnand %p4448_p13, %p4755_p0 }
  0x74   : > { %p4451_p6 = pneg %p4450_p5 }
  0x76   : > { %p4456_p10 = pnand %p4454_p9, %p4451_p6 }
  0x78   : > { %4459 = shalt.err (!%p4456_p10)
}
  0x79   : > { %s4460_s30 = scalar_lea.vmem %s457_s21, 4096  ;;  %p4468_p4 = scmp.lt.s32.totalorder %s457_s21, %s457_s21 }
  0x7a   : > { %p4461_p1 = scmp.ne.s32.totalorder %s457_s21, %s4460_s30  ;;  %p4469_p7 = scmp.lt.s32.totalorder %s4460_s30, %s4460_s30 }
  0x7c   : > { %p4463_p2 = pnand %p4461_p1, %p4755_p0  ;;  %p4470_p8 = por %p4469_p7, %p4468_p4 }
  0x7e   : > { %p4464_p3 = pneg %p4463_p2 }
  0x80   : > { %p4471_p11 = pnand %p4470_p8, %p4464_p3 }
  0x82   : > { %4474 = shalt.err (!%p4471_p11)
}
  0x83   : > { %4239 = dma.hbm_to_vmem [thread:$0]  (!%p4741_p12), %s5221_s7, 4096, %s457_s21, [#allocation6], %s4586_s14, %s4586_s14, %s4587_s15  }
  0x84   : > { %s4475_s0 = scalar_lea.hbm %s5226_s12, 8192 }
  0x85   : > { %p4476_p13 = scmp.ne.s32.totalorder %s5226_s12, %s4475_s0  ;;  %p4482_p9 = scmp.lt.u32.totalorder %s4475_s0, %s5226_s12 }
  0x87   : > { %p4478_p5 = pnand %p4476_p13, %p4755_p0 }
  0x89   : > { %p4479_p6 = pneg %p4478_p5 }
  0x8b   : > { %p4484_p10 = pnand %p4482_p9, %p4479_p6 }
  0x8d   : > { %4487 = shalt.err (!%p4484_p10)
}
  0x8e   : > { %s4488_s20 = scalar_lea.vmem %s492_s27, 8192  ;;  %p4496_p4 = scmp.lt.s32.totalorder %s492_s27, %s492_s27 }
  0x8f   : > { %p4489_p1 = scmp.ne.s32.totalorder %s492_s27, %s4488_s20  ;;  %p4497_p7 = scmp.lt.s32.totalorder %s4488_s20, %s4488_s20 }
  0x91   : > { %p4491_p2 = pnand %p4489_p1, %p4755_p0  ;;  %p4498_p8 = por %p4497_p7, %p4496_p4 }
  0x93   : > { %p4492_p3 = pneg %p4491_p2 }
  0x95   : > { %p4499_p11 = pnand %p4498_p8, %p4492_p3 }
  0x97   : > { %4502 = shalt.err (!%p4499_p11)
}
  0x98   : > { %4245 = dma.hbm_to_vmem [thread:$0]  (!%p4741_p12), %s5226_s12, 8192, %s492_s27, [#allocation9], %s4586_s14, %s4586_s14, %s4587_s15  }
  0x99   : > { %p5265_p13 = scmp.ne.s32.totalorder %s5260_s18, 0 }
  0x9a   : > { %p5266_p0 = scmp.eq.s32.totalorder (!%p5265_p13), %s4705_s25, 0 }
  0x9b   : > { %529 = sbr.rel (%p5265_p13) target bundleno = 5932 (0x172c), region = 84 }
  0xa2   : > { %4548 = dma.done.wait (%p5266_p0), [#allocation3], 2048   ;;  %p5267_p5 = pmov %p5266_p0 }
  0xa3   : > { %p5268_p6 = pmov %p5266_p0 }
  0xa4   : > { %4550 = vsyncadd (%p5267_p5), [#allocation3], 4294965248 }
  0xa5   : > { %4552 = dma.done.wait (%p5268_p6), [#allocation6], 16384   ;;  %p5269_p9 = pmov %p5266_p0 }
  0xa6   : > { %p5270_p10 = pmov %p5266_p0 }
  0xa7   : > { %4554 = vsyncadd (%p5269_p9), [#allocation6], 4294950912 }
  0xa8   : > { %4556 = dma.done.wait (%p5270_p10), [#allocation9], 16384   ;;  %p5271_p12 = pmov %p5266_p0 }
  0xa9   : > { %p597_p1 = scmp.lt.s32.totalorder %s4705_s25, 1  ;;  %v4590_v0 = vmov 0   ;;  %v4591_v1 = vmov 0.0|0.0   ;;  %s5272_s15 = sld [smem:[#allocation24_spill]]  ;;  %v613_v3 = vld [vmem:[#allocation2] sm:$0xff]  ;;  %v614_v4 = vld [vmem:[#allocation2 + $0x8] sm:$0xff]  ;;  %v605_v28 = vlaneseq }
  0xaa   : > { %4558 = vsyncadd (%p5271_p12), [#allocation9], 4294950912  ;;  %4312 = vset.pattern.permute.xlu0 %v4590_v0  ;;  %3896 = vmatprep.subr.bf16.mxu0 %v4591_v1  ;;  %v615_v5 = vld [vmem:[#allocation2 + $0x10] sm:$0xff]  ;;  %v616_v6 = vld [vmem:[#allocation2 + $0x18] sm:$0xff]  ;;  %vm4592_vm0 = vmmov 0   ;;  %v4593_v7 = vmov 0.0   ;;  %v3897_v8 = vpack.c.bf16 %v614_v4, %v613_v3 }
  0xab   : > { %s4874_s18 = scalar_select %p597_p1, %s4705_s25, 1  ;;  %3673 = vmatprep.mubr.msk.f32.mxu0 %vm4592_vm0, %v4593_v7  ;;  %843 = vmatprep.mubr.f32.mxu1 %v4593_v7  ;;  %v3900_v9 = vpack.c.bf16 %v616_v6, %v615_v5  ;;  %v617_v10 = vld [vmem:[#allocation2 + $0x20] sm:$0xff]  ;;  %v618_v11 = vld [vmem:[#allocation2 + $0x28] sm:$0xff]  ;;  %v619_v13 = vld [vmem:[#allocation2 + $0x30] sm:$0xff]  ;;  %v606_v29 = vand.u32 127, %v605_v28  ;;  %v4594_v31 = vmov 1.0  }
  0xac   : > { %3898 = vmatpush3.bf16.msra.mxu0 %v3897_v8  ;;  %v3903_v12 = vpack.c.bf16 %v618_v11, %v617_v10  ;;  %v620_v14 = vld [vmem:[#allocation2 + $0x38] sm:$0xff]  ;;  %v621_v16 = vld [vmem:[#allocation2 + $0x40] sm:$0xff]  ;;  %v622_v17 = vld [vmem:[#allocation2 + $0x48] sm:$0xff]  ;;  %vm944_vm2 = vcmask 261120   ;;  %s4595_s24 = smov 32   ;;  %s4596_s17 = smov 96  }
  0xad   : > { %s3405_s26 = sshll.u32 %s4874_s18, 3  ;;  %3899 = vmatprep.subr.bf16.mxu0 %v4591_v1  ;;  %v3906_v15 = vpack.c.bf16 %v620_v14, %v619_v13  ;;  %v3909_v18 = vpack.c.bf16 %v622_v17, %v621_v16  ;;  %v623_v19 = vld [vmem:[#allocation2 + $0x50] sm:$0xff]  ;;  %v624_v20 = vld [vmem:[#allocation2 + $0x58] sm:$0xff]  ;;  %v625_v22 = vld [vmem:[#allocation2 + $0x60] sm:$0xff]  ;;  %s4597_s28 = smov 64   ;;  %vm1255_vm3 = vcmask 64512  }
  0xae   : > { %v3912_v21 = vpack.c.bf16 %v624_v20, %v623_v19  ;;  %v626_v23 = vld [vmem:[#allocation2 + $0x68] sm:$0xff]  ;;  %v627_v25 = vld [vmem:[#allocation2 + $0x70] sm:$0xff]  ;;  %v628_v26 = vld [vmem:[#allocation2 + $0x78] sm:$0xff]  ;;  %s603_s21 = scalar_lea.vmem %s5215_s1, %s4874_s18  ;;  %vm1605_vm4 = vcmask 523264   ;;  %vm1607_vm5 = vcmask 785408   ;;  %s5274_s14 = sld [smem:[#allocation22_spill]] }
  0xaf   : > { %s600_s27 = scalar_lea.vmem %s5272_s15, %s3405_s26  ;;  %v3915_v24 = vpack.c.bf16 %v626_v23, %v625_v22  ;;  %v3918_v27 = vpack.c.bf16 %v628_v26, %v627_v25  ;;  %v629_v32 = vld [vmem:[%s5217_s3] sm:$0xff]  ;;  %v732_v36 = vld [vmem:[#allocation5 + $0x8] sm:$0xff]  ;;  %v734_v40 = vld [vmem:[#allocation5 + $0x18] sm:$0xff]  ;;  %s5275_s30 = sld [smem:[#allocation27_spill]] }
  0xb0   : > { %v604_v2 = vld [vmem:[%s600_s27] sm:$0xff]  ;;  %3901 = vmatpush3.bf16.msra.mxu0 %v3900_v9  ;;  %v733_v41 = vld [vmem:[#allocation5 + $0x10] sm:$0xff]  ;;  %v736_v42 = vld [vmem:[#allocation5 + $0x28] sm:$0xff]  ;;  %s5276_s6 = sld [smem:[#allocation28_spill]]  ;;  %s3451_s16 = sshll.u32 %s4705_s25, 7 }
  0xb1   : > { %608 = vperm.xlu0 %4312, %v604_v2   ;;  %3902 = vmatprep.subr.bf16.mxu0 %v4591_v1  ;;  %v735_v37 = vld [vmem:[#allocation5 + $0x20] sm:$0xff]  ;;  %v3953_v44 = vpack.c.bf16 %v736_v42, %v733_v41  ;;  %v738_v45 = vld [vmem:[#allocation5 + $0x38] sm:$0xff]  ;;  %v741_v46 = vld [vmem:[#allocation5 + $0x50] sm:$0xff]  ;;  %s5277_s23 = sld [smem:[#allocation29_spill]]  ;;  %s4598_s25 = smov [#allocation11]  }
  0xb2   : > { %v731_v38 = vld [vmem:[#allocation5] sm:$0xff]  ;;  %v3920_v39 = vpack.c.bf16 %v735_v37, %v732_v36  ;;  %v737_v47 = vld [vmem:[#allocation5 + $0x30] sm:$0xff]  ;;  %v3924_v48 = vpack.c.bf16 %v741_v46, %v738_v45  ;;  %v740_v49 = vld [vmem:[#allocation5 + $0x48] sm:$0xff] }
  0xb3   : > { %v3922_v43 = vpack.c.bf16 %v734_v40, %v731_v38  ;;  %v739_v50 = vld [vmem:[#allocation5 + $0x40] sm:$0xff]  ;;  %v742_v51 = vld [vmem:[#allocation5 + $0x58] sm:$0xff]  ;;  %v3926_v52 = vpack.c.bf16 %v740_v49, %v737_v47  ;;  %v744_v54 = vld [vmem:[#allocation5 + $0x68] sm:$0xff] }
  0xb4   : > { %3904 = vmatpush3.bf16.msra.mxu0 %v3903_v12  ;;  %3921 = vmatprep.subr.bf16.mxu1 %v3920_v39  ;;  %v3956_v53 = vpack.c.bf16 %v742_v51, %v739_v50  ;;  %v747_v55 = vld [vmem:[#allocation5 + $0x80] sm:$0xff]  ;;  %v746_v58 = vld [vmem:[#allocation5 + $0x78] sm:$0xff]  ;;  %v745_v59 = vld [vmem:[#allocation5 + $0x70] sm:$0xff]  ;;  %p5279_p3 = scmp.ne.s32.totalorder %s5274_s14, 0 }
  0xb5   : > { %3905 = vmatprep.subr.bf16.mxu0 %v4591_v1  ;;  %3923 = vmatpush1.bf16.msra.mxu1 %v3922_v43  ;;  %v743_v56 = vld [vmem:[#allocation5 + $0x60] sm:$0xff]  ;;  %v3928_v57 = vpack.c.bf16 %v747_v55, %v744_v54  ;;  %v748_v60 = vld [vmem:[#allocation5 + $0x88] sm:$0xff]  ;;  %v750_v4 = vld [vmem:[#allocation5 + $0x98] sm:$0xff] }
  0xb6   : > { %3925 = vmatprep.subr.bf16.mxu1 %v3924_v48  ;;  %v3930_v61 = vpack.c.bf16 %v746_v58, %v743_v56  ;;  %v3959_v62 = vpack.c.bf16 %v748_v60, %v745_v59  ;;  %v753_v5 = vld [vmem:[#allocation5 + $0xb0] sm:$0xff]  ;;  %v752_v9 = vld [vmem:[#allocation5 + $0xa8] sm:$0xff]  ;;  %v751_v10 = vld [vmem:[#allocation5 + $0xa0] sm:$0xff] }
  0xb7   : > { %v3932_v6 = vpack.c.bf16 %v753_v5, %v750_v4  ;;  %v749_v8 = vld [vmem:[#allocation5 + $0x90] sm:$0xff]  ;;  %v754_v12 = vld [vmem:[#allocation5 + $0xb8] sm:$0xff]  ;;  %v756_v14 = vld [vmem:[#allocation5 + $0xc8] sm:$0xff]  ;;  %s5278_s20 = smov %s5277_s23 }
  0xb8   : > { %3907 = vmatpush3.bf16.msra.mxu0 %v3906_v15  ;;  %v3934_v11 = vpack.c.bf16 %v752_v9, %v749_v8  ;;  %v3962_v13 = vpack.c.bf16 %v754_v12, %v751_v10  ;;  %v759_v15 = vld [vmem:[#allocation5 + $0xe0] sm:$0xff]  ;;  %v757_v19 = vld [vmem:[#allocation5 + $0xd0] sm:$0xff]  ;;  %v762_v22 = vld [vmem:[#allocation5 + $0xf8] sm:$0xff] }
  0xb9   : > { %3908 = vmatprep.subr.bf16.mxu0 %v4591_v1  ;;  %3927 = vmatpush1.bf16.msra.mxu1 %v3926_v52  ;;  %v3936_v16 = vpack.c.bf16 %v759_v15, %v756_v14  ;;  %v755_v17 = vld [vmem:[#allocation5 + $0xc0] sm:$0xff]  ;;  %v765_v23 = vld [vmem:[#allocation5 + $0x110] sm:$0xff]  ;;  %v770_v38 = vld [vmem:[#allocation5 + $0x138] sm:$0xff] }
  0xba   : > { %3929 = vmatprep.subr.bf16.mxu1 %v3928_v57  ;;  %v3940_v25 = vpack.c.bf16 %v765_v23, %v762_v22  ;;  %v761_v26 = vld [vmem:[#allocation5 + $0xf0] sm:$0xff]  ;;  %v767_v37 = vld [vmem:[#allocation5 + $0x120] sm:$0xff]  ;;  %v772_v40 = vld [vmem:[#allocation5 + $0x148] sm:$0xff] }
  0xbb   : > { %v769_v39 = vld [vmem:[#allocation5 + $0x130] sm:$0xff]  ;;  %v774_v41 = vld [vmem:[#allocation5 + $0x158] sm:$0xff]  ;;  %v3946_v43 = vpack.c.bf16 %v770_v38, %v767_v37  ;;  %v776_v47 = vld [vmem:[#allocation5 + $0x168] sm:$0xff] }
  0xbc   : > { %3910 = vmatpush3.bf16.msra.mxu0 %v3909_v18  ;;  %v758_v18 = vld [vmem:[#allocation5 + $0xd8] sm:$0xff]  ;;  %v777_v42 = vld [vmem:[#allocation5 + $0x170] sm:$0xff]  ;;  %v775_v48 = vld [vmem:[#allocation5 + $0x160] sm:$0xff] }
  0xbd   : > { %3911 = vmatprep.subr.bf16.mxu0 %v4591_v1  ;;  %3931 = vmatpush1.bf16.msra.mxu1 %v3930_v61  ;;  %v3938_v20 = vpack.c.bf16 %v758_v18, %v755_v17  ;;  %v3948_v45 = vpack.c.bf16 %v777_v42, %v774_v41  ;;  %v773_v46 = vld [vmem:[#allocation5 + $0x150] sm:$0xff]  ;;  %v778_v49 = vld [vmem:[#allocation5 + $0x178] sm:$0xff]  ;;  %v3408_v56 = vld [vmem:[%s5218_s4] ss:$0 sm:$0xff] }
  0xbe   : > { %3933 = vmatprep.subr.bf16.mxu1 %v3932_v6  ;;  %v3950_v50 = vpack.c.bf16 %v776_v47, %v773_v46  ;;  %v3974_v51 = vpack.c.bf16 %v778_v49, %v775_v48  ;;  %v3409_v58 = vld [vmem:[%s5219_s5] ss:$0 sm:$0xff] }
  0xbf   : > { %v700_v9 = vld [vmem:[%s603_s21] sm:$0x1]  ;;  %s5273_s21 = sld [smem:[#allocation17_spill]] }
  0xc0   : > { %3913 = vmatpush3.bf16.msra.mxu0 %v3912_v21  ;;  %v760_v21 = vld [vmem:[#allocation5 + $0xe8] sm:$0xff]  ;;  %v701_v10 = vsub.f32 1.0, %v700_v9 }
  0xc1   : > { %3914 = vmatprep.subr.bf16.mxu0 %v4591_v1  ;;  %3935 = vmatpush1.bf16.msra.mxu1 %v3934_v11  ;;  %v4960_v11 = vshrl.u32 %v605_v28, 7 }
  0xc2   : > { %3937 = vmatprep.subr.bf16.mxu1 %v3936_v16  ;;  %v702_v12 = vmul.f32 -1e+09, %v701_v10 }
  0xc4   : > { %3916 = vmatpush3.bf16.msra.mxu0 %v3915_v24  ;;  %v3965_v24 = vpack.c.bf16 %v760_v21, %v757_v19 }
  0xc5   : > { %3917 = vmatprep.subr.bf16.mxu0 %v4591_v1  ;;  %3939 = vmatpush1.bf16.msra.mxu1 %v3938_v20  ;;  %s594_s26 = sand.u32 1, %s5273_s21   ;;  %s5172_s21 = scalar_lea.hbm %s5277_s23, %s3451_s16 }
  0xc6   : > { %3941 = vmatprep.subr.bf16.mxu1 %v3940_v25  ;;  %s3404_s19 = sshll.u32 %s594_s26, 3  ;;  %s3259_s29 = scalar_lea.sflag [#allocation4], %s594_s26 }
  0xc7   : > { %s596_s0 = scalar_lea.vmem [#allocation11], %s3404_s19  ;;  %s4507_s19 = sshll.u32 %s4598_s25, 4  ;;  %s4508_s19 = int_to_ptr.vmem [resolvable:$false] %s4507_s19 }
  0xc8   : > { %3919 = vmatpush3.bf16.msra.mxu0 %v3918_v27  ;;  %v764_v27 = vld [vmem:[#allocation5 + $0x108] sm:$0xff]  ;;  %s4509_s15 = scalar_lea.vmem %s4508_s19, 256 }
  0xc9   : > { %3952 = vmatprep.subr.bf16.mxu0 %v4591_v1 }
 0x130   : > { %v609_v30 = vpop.permute.xlu0 %608 }
 0x131   : > { %vm610_vm1 = vcmp.eq.s32.totalorder %v609_v30, %v606_v29  ;;  %v763_v29 = vld [vmem:[#allocation5 + $0x100] sm:$0xff]  ;;  %v3942_v30 = vpack.c.bf16 %v764_v27, %v761_v26 }
 0x132   : > { %3674 = vmatmul.mubr.msk.f32.vlgmr.msra.gmra.mrb[0].mxu0 %vm610_vm1, %v4594_v31  ;;  %v766_v31 = vld [vmem:[#allocation5 + $0x118] sm:$0xff] }
 0x133   : > { %3708 = vmatprep.mubr.msk.f32.mxu0 %vm4592_vm0, %v4593_v7  ;;  %3954 = vmatpush3.bf16.msra.mxu0 %v3953_v44  ;;  %v3971_v44 = vpack.c.bf16 %v772_v40, %v769_v39 }
 0x134   : > { %3955 = vmatprep.subr.bf16.mxu0 %v4591_v1  ;;  %3943 = vmatpush1.bf16.msra.mxu1 %v3942_v30 }
 0x137   : > { %3957 = vmatpush3.bf16.msra.mxu0 %v3956_v53 }
 0x138   : > { %3958 = vmatprep.subr.bf16.mxu0 %v4591_v1 }
 0x13b   : > { %3960 = vmatpush3.bf16.msra.mxu0 %v3959_v62 }
 0x13c   : > { %3961 = vmatprep.subr.bf16.mxu0 %v4591_v1 }
 0x13f   : > { %3963 = vmatpush3.bf16.msra.mxu0 %v3962_v13  ;;  %v4963_v13 = vsub.s32 0, %v4960_v11 }
 0x140   : > { %3964 = vmatprep.subr.bf16.mxu0 %v4591_v1 }
 0x141   : > { %v4966_v14 = vrot.slane %v702_v12, %v4963_v13  ;;  %v1609_v12 = vld [vmem:[#allocation7] sm:$0xff] }
 0x143   : > { %3966 = vmatpush3.bf16.msra.mxu0 %v3965_v24 }
 0x144   : > { %3967 = vmatprep.subr.bf16.mxu0 %v4591_v1 }
 0x205   : > { %v696_v33 = vpop.f32.mrb[0].mxu0 }
 0x206   : > { %v4897_v34 = vadd.f32 %v696_v33, %v629_v32  ;;  %v3675_v35 = vpop.f32.mrb[1].mxu0  ;;  %v768_v32 = vld [vmem:[#allocation5 + $0x128] sm:$0xff]  ;;  %v771_v33 = vld [vmem:[#allocation5 + $0x140] sm:$0xff] }
 0x207   : > { %v3968_v35 = vpack.c.bf16 %v766_v31, %v763_v29  ;;  %v3944_v36 = vpack.c.bf16 %v771_v33, %v768_v32 }
 0x208   : > { %705 = vadd.xlane.f32.xlu0 %v4897_v34 }
 0x209   : > { %3969 = vmatpush3.bf16.msra.mxu0 %v3968_v35  ;;  %3945 = vmatprep.subr.bf16.mxu1 %v3944_v36 }
 0x20a   : > { %3970 = vmatprep.subr.bf16.mxu0 %v4591_v1  ;;  %3947 = vmatpush1.bf16.msra.mxu1 %v3946_v43 }
 0x20b   : > { %3949 = vmatprep.subr.bf16.mxu1 %v3948_v45 }
 0x20d   : > { %3972 = vmatpush3.bf16.msra.mxu0 %v3971_v44 }
 0x20e   : > { %3973 = vmatprep.subr.bf16.mxu0 %v4591_v1  ;;  %3951 = vmatpush1.bf16.msra.mxu1 %v3950_v50 }
 0x20f   : > { %3711 = vmatprep.subr.mxu1 %v4593_v7 }
 0x211   : > { %3975 = vmatpush3.bf16.msra.mxu0 %v3974_v51 }
 0x212   : > { %3976 = vmatprep.subr.bf16.mxu0 %v4591_v1 }
 0x295   : > { %v706_v63 = vpop.xlane.xlu0 %705 }
 0x296   : > { %v708_v0 = vmul.f32 0.0078125, %v706_v63 }
 0x298   : > { %v4904_v2 = vsub.f32 %v4897_v34, %v708_v0 }
 0x29a   : > { %v710_v3 = vmul.f32 %v4904_v2, %v4904_v2 }
 0x29c   : > { %711 = vadd.xlane.f32.xlu1 %v710_v3 }
 0x329   : > { %v712_v52 = vpop.xlane.xlu1 %711 }
 0x32a   : > { %v713_v53 = vmul.f32 0.0078125, %v712_v52 }
 0x32c   : > { %v714_v54 = vadd.f32 1e-05, %v713_v53 }
 0x32e   : > { %4313 = vrsqrt.f32 %v714_v54 }
 0x338   : > { %v4314_v55 = vpop.eup %4313 }
 0x339   : > { %v716_v57 = vmul.f32 %v4314_v55, %v4904_v2 }
 0x33b   : > { %v723_v59 = vmul.f32 %v3408_v56, %v716_v57 }
 0x33d   : > { %v730_v60 = vadd.f32 %v3409_v58, %v723_v59 }
 0x33f   : > { %844 = vmatmul.mubr.f32.vlgmr.msra.gmra.mrb[0].mxu1 %v730_v60  ;;  %3709 = vmatmul.mubr.f32.vlgmr.msra.gmra.mrb[2].mxu0 %v730_v60 }
 0x340   : > { %3713 = vmatprep.mubr.msk.f32.mxu1 %vm4592_vm0, %v4593_v7  ;;  %3783 = vmatprep.mubr.msk.f32.mxu0 %vm4592_vm0, %v4593_v7 }
 0x412   : > { %v845_v61 = vpop.f32.mrb[0].mxu1  ;;  %v4925_v62 = vpop.f32.mrb[2].mxu0 }
 0x413   : > { %925 = vrot.lane.b32.xlu0 %v845_v61, %s4595_s24  ;;  %921 = vrot.lane.b32.xlu1 %v845_v61, %s4596_s17  ;;  %v847_v63 = vpop.f32.mrb[1].mxu1  ;;  %v3710_v0 = vpop.f32.mrb[3].mxu0 }
 0x414   : > { %3712 = vmatpush3.xpose.msk.msra.mxu1 %vm944_vm2, %v847_v63 }
 0x415   : > { %3716 = vmatprep.subr.mxu1 %v4593_v7 }
 0x417   : > { %923 = vrot.lane.b32.xlu1 %v845_v61, %s4597_s28  ;;  %3714 = vmatmul.mubr.msk.f32.vlgmr.msra.gmra.mrb[2].mxu1 %vm944_vm2, %v845_v61 }
 0x418   : > { %3718 = vmatprep.mubr.msk.f32.mxu1 %vm4592_vm0, %v4593_v7 }
 0x41b   : > { %928 = vrot.lane.b32.xlu1 %v847_v63, %s4596_s17 }
 0x41f   : > { %930 = vrot.lane.b32.xlu1 %v847_v63, %s4597_s28 }
 0x423   : > { %932 = vrot.lane.b32.xlu1 %v847_v63, %s4595_s24 }
 0x485   : > { %v922_v2 = vpop.permute.xlu1 %921  ;;  %v926_v8 = vpop.permute.xlu0 %925 }
 0x489   : > { %v924_v3 = vpop.permute.xlu1 %923 }
 0x48d   : > { %v929_v4 = vpop.permute.xlu1 %928 }
 0x48e   : > { %3717 = vmatpush3.xpose.msk.msra.mxu1 %vm944_vm2, %v929_v4 }
 0x48f   : > { %3721 = vmatprep.subr.mxu1 %v4593_v7 }
 0x491   : > { %v931_v5 = vpop.permute.xlu1 %930  ;;  %3719 = vmatmul.mubr.msk.f32.vlgmr.msra.gmra.mrb[4].mxu1 %vm944_vm2, %v922_v2 }
 0x492   : > { %3722 = vmatpush3.xpose.msk.msra.mxu1 %vm944_vm2, %v931_v5  ;;  %3723 = vmatprep.mubr.msk.f32.mxu1 %vm4592_vm0, %v4593_v7 }
 0x493   : > { %3726 = vmatprep.subr.mxu1 %v4593_v7 }
 0x495   : > { %v933_v6 = vpop.permute.xlu1 %932  ;;  %3724 = vmatmul.mubr.msk.f32.vlgmr.msra.gmra.mrb[6].mxu1 %vm944_vm2, %v924_v3 }
 0x496   : > { %3727 = vmatpush3.xpose.msk.msra.mxu1 %vm944_vm2, %v933_v6  ;;  %3728 = vmatprep.mubr.msk.f32.mxu1 %vm4592_vm0, %v4593_v7 }
 0x497   : > { %3731 = vmatprep.subr.mxu1 %v4593_v7 }
 0x499   : > { %3729 = vmatmul.mubr.msk.f32.vlgmr.msra.gmra.mrb[8].mxu1 %vm944_vm2, %v926_v8 }
 0x49a   : > { %3732 = vmatpush3.msra.mxu1 %v4925_v62  ;;  %3733 = vmatprep.mubr.msk.f32.mxu1 %vm4592_vm0, %v4593_v7 }
 0x49b   : > { %3736 = vmatprep.subr.mxu1 %v4593_v7 }
 0x4ea   : > { %v1015_v15 = vpop.f32.mrb[2].mxu1 }
 0x4eb   : > { %v1241_v16 = vmul.f32 0.17677669, %v1015_v15  ;;  %v3715_v17 = vpop.f32.mrb[3].mxu1  ;;  %v1610_v15 = vld [vmem:[#allocation7 + $0x8] sm:$0xff] }
 0x4ec   : > { %v3977_v17 = vpack.c.bf16 %v1610_v15, %v1609_v12 }
 0x4ed   : > { %v1251_v18 = vadd.f32 %v4966_v14, %v1241_v16  ;;  %v1611_v16 = vld [vmem:[#allocation7 + $0x10] sm:$0xff] }
 0x4ee   : > { %3978 = vmatpush3.bf16.msra.mxu0 %v3977_v17  ;;  %v1738_v17 = vld [vmem:[#allocation8 + $0x78] sm:$0xff] }
 0x4ef   : > { %v1256_v19 = vsel %vm1255_vm3, %v1251_v18, -inf  ;;  %3979 = vmatprep.subr.bf16.mxu0 %v4591_v1 }
 0x4f0   : > { %1257 = vmax.xlane.f32.xlu1 %v1256_v19 }
 0x564   : > { %v1089_v20 = vpop.f32.mrb[4].mxu1 }
 0x565   : > { %v1242_v21 = vmul.f32 0.17677669, %v1089_v20  ;;  %v3720_v28 = vpop.f32.mrb[5].mxu1  ;;  %v1613_v20 = vld [vmem:[#allocation7 + $0x20] sm:$0xff] }
 0x567   : > { %v1252_v22 = vadd.f32 %v4966_v14, %v1242_v21  ;;  %v1614_v21 = vld [vmem:[#allocation7 + $0x28] sm:$0xff] }
 0x568   : > { %v1163_v23 = vpop.f32.mrb[6].mxu1  ;;  %v3983_v28 = vpack.c.bf16 %v1614_v21, %v1613_v20  ;;  %v1737_v20 = vld [vmem:[#allocation8 + $0x70] sm:$0xff] }
 0x569   : > { %v1243_v24 = vmul.f32 0.17677669, %v1163_v23  ;;  %v3725_v25 = vpop.f32.mrb[7].mxu1  ;;  %v1259_v26 = vsel %vm1255_vm3, %v1252_v22, -inf  ;;  %v1615_v23 = vld [vmem:[#allocation7 + $0x30] sm:$0xff] }
 0x56a   : > { %1260 = vmax.xlane.f32.xlu0 %v1259_v26 }
 0x56b   : > { %v1253_v27 = vadd.f32 %v4966_v14, %v1243_v24  ;;  %v1616_v24 = vld [vmem:[#allocation7 + $0x38] sm:$0xff] }
 0x56c   : > { %v1237_v29 = vpop.f32.mrb[8].mxu1  ;;  %v3986_v26 = vpack.c.bf16 %v1616_v24, %v1615_v23  ;;  %v1739_v24 = vld [vmem:[#allocation8 + $0x80] sm:$0xff] }
 0x56d   : > { %v1244_v30 = vmul.f32 0.17677669, %v1237_v29  ;;  %v3730_v31 = vpop.f32.mrb[9].mxu1  ;;  %v1262_v32 = vsel %vm1255_vm3, %v1253_v27, -inf  ;;  %v1617_v29 = vld [vmem:[#allocation7 + $0x40] sm:$0xff] }
 0x56e   : > { %1263 = vmax.xlane.f32.xlu1 %v1262_v32 }
 0x56f   : > { %v1254_v33 = vadd.f32 %v4966_v14, %v1244_v30  ;;  %v1618_v30 = vld [vmem:[#allocation7 + $0x48] sm:$0xff] }
 0x570   : > { %v3989_v32 = vpack.c.bf16 %v1618_v30, %v1617_v29  ;;  %v1746_v29 = vld [vmem:[#allocation8 + $0xb8] sm:$0xff]  ;;  %v1743_v30 = vld [vmem:[#allocation8 + $0xa0] sm:$0xff] }
 0x571   : > { %v1265_v35 = vsel %vm1255_vm3, %v1254_v33, -inf }
 0x572   : > { %1266 = vmax.xlane.f32.xlu1 %v1265_v35  ;;  %v1620_v35 = vld [vmem:[#allocation7 + $0x58] sm:$0xff] }
 0x57d   : > { %v1258_v36 = vpop.xlane.xlu1 %1257 }
 0x57e   : > { %v1268_v37 = vsub.f32 %v1251_v18, %v1258_v36  ;;  %v1612_v18 = vld [vmem:[#allocation7 + $0x18] sm:$0xff] }
 0x57f   : > { %v3980_v19 = vpack.c.bf16 %v1612_v18, %v1611_v16  ;;  %v1736_v16 = vld [vmem:[#allocation8 + $0x68] sm:$0xff] }
 0x580   : > { %v1272_v38 = vmul.f32 1.442695, %v1268_v37  ;;  %v1621_v37 = vld [vmem:[#allocation7 + $0x60] sm:$0xff]  ;;  %v4012_v18 = vpack.c.bf16 %v1738_v17, %v1736_v16  ;;  %v1879_v16 = vld [vmem:[#allocation10 + $0xb8] sm:$0xff] }
 0x581   : > { %3981 = vmatpush3.bf16.msra.mxu0 %v3980_v19  ;;  %v1735_v19 = vld [vmem:[#allocation8 + $0x60] sm:$0xff] }
 0x582   : > { %4315 = vpow2.f32 %v1272_v38  ;;  %3982 = vmatprep.subr.bf16.mxu0 %v4591_v1  ;;  %v1622_v38 = vld [vmem:[#allocation7 + $0x68] sm:$0xff]  ;;  %v4014_v21 = vpack.c.bf16 %v1737_v20, %v1735_v19  ;;  %v1863_v19 = vld [vmem:[#allocation10 + $0x38] sm:$0xff] }
 0x585   : > { %3984 = vmatpush3.bf16.msra.mxu0 %v3983_v28  ;;  %v1740_v28 = vld [vmem:[#allocation8 + $0x88] sm:$0xff] }
 0x586   : > { %3985 = vmatprep.subr.bf16.mxu0 %v4591_v1 }
 0x589   : > { %3987 = vmatpush3.bf16.msra.mxu0 %v3986_v26  ;;  %v1744_v26 = vld [vmem:[#allocation8 + $0xa8] sm:$0xff] }
 0x58a   : > { %3988 = vmatprep.subr.bf16.mxu0 %v4591_v1 }
 0x58c   : > { %v4316_v39 = vpop.eup %4315 }
 0x58d   : > { %v1280_v40 = vsel %vm1255_vm3, %v4316_v39, 0.0  ;;  %3990 = vmatpush3.bf16.msra.mxu0 %v3989_v32  ;;  %v4020_v32 = vpack.c.bf16 %v1746_v29, %v1744_v26  ;;  %v1883_v26 = vld [vmem:[#allocation10 + $0xd8] sm:$0xff] }
 0x58e   : > { %1281 = vadd.xlane.f32.xlu1 %v1280_v40  ;;  %3991 = vmatprep.subr.bf16.mxu0 %v4591_v1  ;;  %v1623_v40 = vld [vmem:[#allocation7 + $0x70] sm:$0xff] }
 0x5f7   : > { %v1261_v41 = vpop.xlane.xlu0 %1260 }
 0x5f8   : > { %v1269_v42 = vsub.f32 %v1252_v22, %v1261_v41  ;;  %v1624_v41 = vld [vmem:[#allocation7 + $0x78] sm:$0xff] }
 0x5fa   : > { %v1274_v43 = vmul.f32 1.442695, %v1269_v42  ;;  %v3998_v42 = vpack.c.bf16 %v1624_v41, %v1623_v40  ;;  %v1752_v40 = vld [vmem:[#allocation8 + $0xe8] sm:$0xff]  ;;  %v1754_v41 = vld [vmem:[#allocation8 + $0xf8] sm:$0xff] }
 0x5fb   : > { %v1264_v44 = vpop.xlane.xlu1 %1263 }
 0x5fc   : > { %4317 = vpow2.f32 %v1274_v43  ;;  %v1270_v45 = vsub.f32 %v1253_v27, %v1264_v44 }
 0x5fe   : > { %v1276_v46 = vmul.f32 1.442695, %v1270_v45 }
 0x5ff   : > { %v1267_v51 = vpop.xlane.xlu1 %1266 }
 0x600   : > { %4319 = vpow2.f32 %v1276_v46  ;;  %v1271_v54 = vsub.f32 %v1254_v33, %v1267_v51  ;;  %v1619_v33 = vld [vmem:[#allocation7 + $0x50] sm:$0xff] }
 0x601   : > { %v3992_v36 = vpack.c.bf16 %v1620_v35, %v1619_v33  ;;  %v1748_v33 = vld [vmem:[#allocation8 + $0xc8] sm:$0xff]  ;;  %v1750_v35 = vld [vmem:[#allocation8 + $0xd8] sm:$0xff] }
 0x602   : > { %v1278_v56 = vmul.f32 1.442695, %v1271_v54  ;;  %v1724_v54 = vld [vmem:[#allocation8 + $0x8] sm:$0xff] }
 0x603   : > { %3993 = vmatpush3.bf16.msra.mxu0 %v3992_v36 }
 0x604   : > { %3994 = vmatprep.subr.bf16.mxu0 %v4591_v1 }
 0x606   : > { %v4318_v47 = vpop.eup %4317 }
 0x607   : > { %v1283_v48 = vsel %vm1255_vm3, %v4318_v47, 0.0 }
 0x608   : > { %1284 = vadd.xlane.f32.xlu1 %v1283_v48 }
 0x60a   : > { %v4320_v49 = vpop.eup %4319 }
 0x60b   : > { %v1286_v50 = vsel %vm1255_vm3, %v4320_v49, 0.0 }
 0x60c   : > { %1287 = vadd.xlane.f32.xlu0 %v1286_v50 }
 0x619   : > { %938 = vrot.lane.b32.xlu1 %v4925_v62, %s4597_s28 }
 0x61b   : > { %v1282_v52 = vpop.xlane.xlu1 %1281 }
 0x61c   : > { %4321 = vrcp.f32 %v1282_v52 }
 0x61d   : > { %4323 = vpow2.f32 %v1278_v56  ;;  %v1723_v56 = vld [vmem:[#allocation8] sm:$0xff] }
 0x622   : > { %935 = vrot.lane.b32.xlu0 %v4925_v62, %s4596_s17 }
 0x626   : > { %v4322_v53 = vpop.eup %4321 }
 0x627   : > { %v1293_v55 = vmul.f32 %v4322_v53, %v4316_v39  ;;  %v4324_v57 = vpop.eup %4323  ;;  %v3995_v39 = vpack.c.bf16 %v1622_v38, %v1621_v37  ;;  %v4024_v37 = vpack.c.bf16 %v1750_v35, %v1748_v33  ;;  %v1747_v38 = vld [vmem:[#allocation8 + $0xc0] sm:$0xff]  ;;  %v1885_v33 = vld [vmem:[#allocation10 + $0xe8] sm:$0xff] }
 0x628   : > { %v1289_v58 = vsel %vm1255_vm3, %v4324_v57, 0.0 }
 0x629   : > { %3734 = vmatmul.mubr.msk.f32.vlgmr.msra.gmra.mrb[10].mxu1 %vm1255_vm3, %v1293_v55  ;;  %3996 = vmatpush3.bf16.msra.mxu0 %v3995_v39  ;;  %v1726_v55 = vld [vmem:[#allocation8 + $0x18] sm:$0xff]  ;;  %v1749_v39 = vld [vmem:[#allocation8 + $0xd0] sm:$0xff] }
 0x62a   : > { %3738 = vmatprep.mubr.msk.f32.mxu1 %vm4592_vm0, %v4593_v7  ;;  %3997 = vmatprep.subr.bf16.mxu0 %v4591_v1 }
 0x62d   : > { %3999 = vmatpush3.bf16.msra.mxu0 %v3998_v42  ;;  %v4026_v42 = vpack.c.bf16 %v1749_v39, %v1747_v38  ;;  %v1869_v38 = vld [vmem:[#allocation10 + $0x68] sm:$0xff]  ;;  %v1886_v39 = vld [vmem:[#allocation10 + $0xf0] sm:$0xff] }
 0x63d   : > { %1290 = vadd.xlane.f32.xlu1 %v1289_v58  ;;  %v1725_v58 = vld [vmem:[#allocation8 + $0x10] sm:$0xff] }
 0x64e   : > { %941 = vrot.lane.b32.xlu1 %v4925_v62, %s4595_s24 }
 0x695   : > { %v1285_v59 = vpop.xlane.xlu1 %1284 }
 0x696   : > { %4325 = vrcp.f32 %v1285_v59  ;;  %v1728_v59 = vld [vmem:[#allocation8 + $0x28] sm:$0xff] }
 0x699   : > { %v1288_v60 = vpop.xlane.xlu0 %1287  ;;  %v939_v2 = vpop.permute.xlu1 %938 }
 0x69a   : > { %4327 = vrcp.f32 %v1288_v60  ;;  %v1730_v60 = vld [vmem:[#allocation8 + $0x38] sm:$0xff] }
 0x69d   : > { %v936_v61 = vpop.permute.xlu0 %935 }
 0x69e   : > { %3737 = vmatpush3.msra.mxu1 %v936_v61  ;;  %v4002_v61 = vpack.c.bf16 %v1725_v58, %v1723_v56  ;;  %v1873_v58 = vld [vmem:[#allocation10 + $0x88] sm:$0xff] }
 0x69f   : > { %3741 = vmatprep.subr.mxu1 %v4593_v7 }
 0x6a0   : > { %v4326_v63 = vpop.eup %4325 }
 0x6a1   : > { %v1295_v0 = vmul.f32 %v4326_v63, %v4318_v47  ;;  %v4004_v63 = vpack.c.bf16 %v1730_v60, %v1728_v59  ;;  %v1856_v60 = vld [vmem:[#allocation10] sm:$0xff] }
 0x6a3   : > { %3739 = vmatmul.mubr.msk.f32.vlgmr.msra.gmra.mrb[12].mxu1 %vm1255_vm3, %v1295_v0  ;;  %v1727_v0 = vld [vmem:[#allocation8 + $0x20] sm:$0xff] }
 0x6a4   : > { %v4328_v3 = vpop.eup %4327  ;;  %3742 = vmatpush3.msra.mxu1 %v939_v2  ;;  %3743 = vmatprep.mubr.msk.f32.mxu1 %vm4592_vm0, %v4593_v7  ;;  %v1729_v2 = vld [vmem:[#allocation8 + $0x30] sm:$0xff] }
 0x6a5   : > { %v1297_v4 = vmul.f32 %v4328_v3, %v4320_v49  ;;  %3746 = vmatprep.subr.mxu1 %v4593_v7  ;;  %v1732_v3 = vld [vmem:[#allocation8 + $0x48] sm:$0xff] }
 0x6a7   : > { %3744 = vmatmul.mubr.msk.f32.vlgmr.msra.gmra.mrb[14].mxu1 %vm1255_vm3, %v1297_v4  ;;  %v1734_v4 = vld [vmem:[#allocation8 + $0x58] sm:$0xff] }
 0x6a8   : > { %3748 = vmatprep.mubr.msk.f32.mxu1 %vm4592_vm0, %v4593_v7 }
 0x6ca   : > { %v1291_v62 = vpop.xlane.xlu1 %1290 }
 0x6cb   : > { %4329 = vrcp.f32 %v1291_v62  ;;  %v4008_v62 = vpack.c.bf16 %v1734_v4, %v1732_v3  ;;  %v1858_v4 = vld [vmem:[#allocation10 + $0x10] sm:$0xff] }
 0x6ce   : > { %v942_v5 = vpop.permute.xlu1 %941 }
 0x6cf   : > { %3747 = vmatpush3.msra.mxu1 %v942_v5  ;;  %v1731_v5 = vld [vmem:[#allocation8 + $0x40] sm:$0xff] }
 0x6d5   : > { %v4330_v6 = vpop.eup %4329 }
 0x6d6   : > { %v1299_v8 = vmul.f32 %v4330_v6, %v4324_v57  ;;  %v4000_v57 = vpack.c.bf16 %v1726_v55, %v1724_v54  ;;  %v1733_v6 = vld [vmem:[#allocation8 + $0x50] sm:$0xff]  ;;  %v3423_v54 = vld [vmem:[%s5223_s9] ss:$0 sm:$0xff] }
 0x6d8   : > { %3749 = vmatmul.mubr.msk.f32.vlgmr.msra.gmra.mrb[16].mxu1 %vm1255_vm3, %v1299_v8  ;;  %4001 = vmatprep.subr.bf16.mxu1 %v4000_v57  ;;  %v4010_v8 = vpack.c.bf16 %v1733_v6, %v1731_v5  ;;  %v1872_v57 = vld [vmem:[#allocation10 + $0x80] sm:$0xff]  ;;  %v1877_v6 = vld [vmem:[#allocation10 + $0xa8] sm:$0xff] }
 0x6d9   : > { %1831 = vmatprep.mubr.f32.mxu1 %v4593_v7  ;;  %4003 = vmatpush1.bf16.msra.mxu1 %v4002_v61  ;;  %v4032_v59 = vpack.c.bf16 %v1873_v58, %v1872_v57  ;;  %v1857_v61 = vld [vmem:[#allocation10 + $0x8] sm:$0xff]  ;;  %v1876_v5 = vld [vmem:[#allocation10 + $0xa0] sm:$0xff] }
 0x6da   : > { %4005 = vmatprep.subr.bf16.mxu1 %v4004_v63  ;;  %v4034_v63 = vpack.c.bf16 %v1857_v61, %v1856_v60 }
 0x6db   : > { %4033 = vmatprep.subr.bf16.mxu0 %v4032_v59 }
 0x6fc   : > { %v1369_v9 = vpop.f32.mrb[10].mxu1 }
 0x6fd   : > { %v3735_v10 = vpop.f32.mrb[11].mxu1 }
 0x776   : > { %v1442_v22 = vpop.f32.mrb[12].mxu1 }
 0x777   : > { %1593 = vrot.lane.b32.xlu0 %v1442_v22, %s4595_s24  ;;  %v3740_v25 = vpop.f32.mrb[13].mxu1  ;;  %v1742_v22 = vld [vmem:[#allocation8 + $0x98] sm:$0xff] }
 0x778   : > { %v4016_v23 = vpack.c.bf16 %v1742_v22, %v1740_v28  ;;  %v1741_v25 = vld [vmem:[#allocation8 + $0x90] sm:$0xff]  ;;  %v1881_v28 = vld [vmem:[#allocation10 + $0xc8] sm:$0xff]  ;;  %v1864_v22 = vld [vmem:[#allocation10 + $0x40] sm:$0xff] }
 0x77a   : > { %v1515_v27 = vpop.f32.mrb[14].mxu1 }
 0x77b   : > { %1597 = vrot.lane.b32.xlu1 %v1515_v27, %s4597_s28  ;;  %v3745_v31 = vpop.f32.mrb[15].mxu1  ;;  %v4018_v27 = vpack.c.bf16 %v1741_v25, %v1739_v24  ;;  %v1865_v24 = vld [vmem:[#allocation10 + $0x48] sm:$0xff]  ;;  %v1882_v25 = vld [vmem:[#allocation10 + $0xd0] sm:$0xff] }
 0x77c   : > { %v1745_v31 = vld [vmem:[#allocation8 + $0xb0] sm:$0xff]  ;;  %v4052_v29 = vpack.c.bf16 %v1883_v26, %v1882_v25 }
 0x77d   : > { %v4022_v36 = vpack.c.bf16 %v1745_v31, %v1743_v30  ;;  %v1866_v30 = vld [vmem:[#allocation10 + $0x50] sm:$0xff]  ;;  %v1867_v31 = vld [vmem:[#allocation10 + $0x58] sm:$0xff] }
 0x77e   : > { %v4054_v35 = vpack.c.bf16 %v1867_v31, %v1866_v30  ;;  %v2003_v30 = vld [vmem:[#allocation5 + $0x1b0] sm:$0xff] }
 0x7ab   : > { %v1588_v43 = vpop.f32.mrb[16].mxu1 }
 0x7ac   : > { %1601 = vrot.lane.b32.xlu0 %v1588_v43, %s4596_s17  ;;  %v3750_v44 = vpop.f32.mrb[17].mxu1  ;;  %v4028_v43 = vpack.c.bf16 %v1754_v41, %v1752_v40  ;;  %v1887_v40 = vld [vmem:[#allocation10 + $0xf8] sm:$0xff] }
 0x7ad   : > { %v1751_v44 = vld [vmem:[#allocation8 + $0xe0] sm:$0xff] }
 0x7e9   : > { %v1594_v45 = vpop.permute.xlu0 %1593 }
 0x7ea   : > { %v1604_v47 = vsel %vm944_vm2, %v1369_v9, %v1594_v45  ;;  %v1753_v45 = vld [vmem:[#allocation8 + $0xf0] sm:$0xff] }
 0x7ed   : > { %v1598_v46 = vpop.permute.xlu1 %1597 }
 0x7ee   : > { %v1606_v48 = vsel %vm1605_vm4, %v1604_v47, %v1598_v46  ;;  %v4030_v46 = vpack.c.bf16 %v1753_v45, %v1751_v44  ;;  %v1871_v44 = vld [vmem:[#allocation10 + $0x78] sm:$0xff] }
 0x81e   : > { %v1602_v49 = vpop.permute.xlu0 %1601 }
 0x81f   : > { %v1608_v50 = vsel %vm1607_vm5, %v1606_v48, %v1602_v49 }
 0x820   : > { %3784 = vmatmul.mubr.f32.vlgmr.msra.gmra.mrb[4].mxu0 %v1608_v50 }
 0x821   : > { %4035 = vmatpush3.bf16.msra.mxu0 %v4034_v63 }
 0x8f3   : > { %v1691_v51 = vpop.f32.mrb[4].mxu0 }
 0x8f4   : > { %v5013_v52 = vadd.f32 %v1691_v51, %v4897_v34  ;;  %v3785_v53 = vpop.f32.mrb[5].mxu0  ;;  %v4006_v34 = vpack.c.bf16 %v1729_v2, %v1727_v0  ;;  %v3422_v51 = vld [vmem:[%s5222_s8] ss:$0 sm:$0xff]  ;;  %v1874_v0 = vld [vmem:[#allocation10 + $0x90] sm:$0xff]  ;;  %v1875_v2 = vld [vmem:[#allocation10 + $0x98] sm:$0xff] }
 0x8f5   : > { %v4036_v3 = vpack.c.bf16 %v1875_v2, %v1874_v0 }
 0x8f6   : > { %1698 = vadd.xlane.f32.xlu1 %v5013_v52  ;;  %4007 = vmatpush1.bf16.msra.mxu1 %v4006_v34  ;;  %v1859_v34 = vld [vmem:[#allocation10 + $0x18] sm:$0xff] }
 0x8f7   : > { %4009 = vmatprep.subr.bf16.mxu1 %v4008_v62  ;;  %v4038_v62 = vpack.c.bf16 %v1859_v34, %v1858_v4  ;;  %4037 = vmatprep.subr.bf16.mxu0 %v4036_v3 }
 0x8f9   : > { %4039 = vmatpush3.bf16.msra.mxu0 %v4038_v62 }
 0x8fa   : > { %4011 = vmatpush1.bf16.msra.mxu1 %v4010_v8  ;;  %v4040_v8 = vpack.c.bf16 %v1877_v6, %v1876_v5 }
 0x8fb   : > { %4013 = vmatprep.subr.bf16.mxu1 %v4012_v18  ;;  %v1862_v18 = vld [vmem:[#allocation10 + $0x30] sm:$0xff] }
 0x8fc   : > { %4041 = vmatprep.subr.bf16.mxu0 %v4040_v8  ;;  %v4046_v20 = vpack.c.bf16 %v1863_v19, %v1862_v18  ;;  %v1998_v19 = vld [vmem:[#allocation5 + $0x188] sm:$0xff] }
 0x8fe   : > { %4015 = vmatpush1.bf16.msra.mxu1 %v4014_v21  ;;  %v1880_v21 = vld [vmem:[#allocation10 + $0xc0] sm:$0xff] }
 0x8ff   : > { %4017 = vmatprep.subr.bf16.mxu1 %v4016_v23  ;;  %v4048_v23 = vpack.c.bf16 %v1881_v28, %v1880_v21  ;;  %v1997_v21 = vld [vmem:[#allocation5 + $0x180] sm:$0xff] }
 0x902   : > { %4019 = vmatpush1.bf16.msra.mxu1 %v4018_v27  ;;  %v4050_v27 = vpack.c.bf16 %v1865_v24, %v1864_v22  ;;  %v2000_v22 = vld [vmem:[#allocation5 + $0x198] sm:$0xff]  ;;  %v2002_v24 = vld [vmem:[#allocation5 + $0x1a8] sm:$0xff] }
 0x903   : > { %4021 = vmatprep.subr.bf16.mxu1 %v4020_v32  ;;  %v1884_v32 = vld [vmem:[#allocation10 + $0xe0] sm:$0xff]  ;;  %v4066_v25 = vpack.c.bf16 %v2000_v22, %v1997_v21 }
 0x904   : > { %v2033_v22 = vld [vmem:[#allocation5 + $0x2a0] sm:$0xff] }
 0x906   : > { %4023 = vmatpush1.bf16.msra.mxu1 %v4022_v36  ;;  %v4056_v36 = vpack.c.bf16 %v1885_v33, %v1884_v32  ;;  %v2006_v32 = vld [vmem:[#allocation5 + $0x1c8] sm:$0xff]  ;;  %v2008_v33 = vld [vmem:[#allocation5 + $0x1d8] sm:$0xff] }
 0x907   : > { %4025 = vmatprep.subr.bf16.mxu1 %v4024_v37  ;;  %v1868_v37 = vld [vmem:[#allocation10 + $0x60] sm:$0xff] }
 0x908   : > { %v4058_v41 = vpack.c.bf16 %v1869_v38, %v1868_v37  ;;  %v2010_v37 = vld [vmem:[#allocation5 + $0x1e8] sm:$0xff]  ;;  %v2013_v38 = vld [vmem:[#allocation5 + $0x200] sm:$0xff] }
 0x90a   : > { %4027 = vmatpush1.bf16.msra.mxu1 %v4026_v42  ;;  %v4060_v42 = vpack.c.bf16 %v1887_v40, %v1886_v39  ;;  %v2009_v39 = vld [vmem:[#allocation5 + $0x1e0] sm:$0xff]  ;;  %v4072_v40 = vpack.c.bf16 %v2013_v38, %v2010_v37 }
 0x90b   : > { %4029 = vmatprep.subr.bf16.mxu1 %v4028_v43  ;;  %v1870_v43 = vld [vmem:[#allocation10 + $0x70] sm:$0xff] }
 0x90c   : > { %v4062_v45 = vpack.c.bf16 %v1871_v44, %v1870_v43  ;;  %v2014_v43 = vld [vmem:[#allocation5 + $0x208] sm:$0xff] }
 0x90e   : > { %4031 = vmatpush1.bf16.msra.mxu1 %v4030_v46  ;;  %v1755_v46 = vld [vmem:[%s5225_s11] sm:$0x3] }
 0x983   : > { %v1699_v9 = vpop.xlane.xlu1 %1698 }
 0x984   : > { %v1700_v10 = vmul.f32 0.0078125, %v1699_v9  ;;  %v1860_v9 = vld [vmem:[#allocation10 + $0x20] sm:$0xff] }
 0x986   : > { %v1701_v12 = vsub.f32 %v5013_v52, %v1700_v10  ;;  %v1861_v10 = vld [vmem:[#allocation10 + $0x28] sm:$0xff] }
 0x988   : > { %v1702_v15 = vmul.f32 %v1701_v12, %v1701_v12 }
 0x98a   : > { %1703 = vadd.xlane.f32.xlu0 %v1702_v15  ;;  %v1878_v15 = vld [vmem:[#allocation10 + $0xb0] sm:$0xff] }
 0x98b   : > { %v4044_v17 = vpack.c.bf16 %v1879_v16, %v1878_v15  ;;  %v3424_v16 = vld [vmem:[%s5227_s13] ss:$0 sm:$0xff] }
 0xa17   : > { %v1704_v47 = vpop.xlane.xlu0 %1703 }
 0xa18   : > { %v1705_v48 = vmul.f32 0.0078125, %v1704_v47  ;;  %v1763_v47 = vsub.s32 1, %v4960_v11 }
 0xa1a   : > { %v1706_v49 = vadd.f32 1e-05, %v1705_v48  ;;  %v1760_v48 = vrot.slane %v1755_v46, %v4963_v13 }
 0xa1c   : > { %4331 = vrsqrt.f32 %v1706_v49  ;;  %v1764_v49 = vrot.slane %v1755_v46, %v1763_v47 }
 0xa26   : > { %v4332_v50 = vpop.eup %4331 }
 0xa27   : > { %v1708_v53 = vmul.f32 %v4332_v50, %v1701_v12  ;;  %v4042_v12 = vpack.c.bf16 %v1861_v10, %v1860_v9 }
 0xa29   : > { %v1715_v55 = vmul.f32 %v3422_v51, %v1708_v53  ;;  %4043 = vmatpush3.bf16.msra.mxu0 %v4042_v12 }
 0xa2a   : > { %4045 = vmatprep.subr.bf16.mxu0 %v4044_v17 }
 0xa2b   : > { %v1722_v56 = vadd.f32 %v3423_v54, %v1715_v55 }
 0xa2d   : > { %1832 = vmatmul.mubr.f32.vlgmr.msra.gmra.mrb[18].mxu1 %v1722_v56  ;;  %4047 = vmatpush3.bf16.msra.mxu0 %v4046_v20  ;;  %v2001_v20 = vld [vmem:[#allocation5 + $0x1a0] sm:$0xff] }
 0xa2e   : > { %2109 = vmatprep.mubr.f32.mxu1 %v4593_v7  ;;  %4049 = vmatprep.subr.bf16.mxu0 %v4048_v23  ;;  %v4064_v28 = vpack.c.bf16 %v2001_v20, %v1998_v19  ;;  %v1999_v23 = vld [vmem:[#allocation5 + $0x190] sm:$0xff]  ;;  %v2034_v19 = vld [vmem:[#allocation5 + $0x2a8] sm:$0xff]  ;;  %v2037_v20 = vld [vmem:[#allocation5 + $0x2c0] sm:$0xff] }
 0xa2f   : > { %v4097_v26 = vpack.c.bf16 %v2002_v24, %v1999_v23  ;;  %v2036_v23 = vld [vmem:[#allocation5 + $0x2b8] sm:$0xff]  ;;  %v2035_v24 = vld [vmem:[#allocation5 + $0x2b0] sm:$0xff] }
 0xa30   : > { %4065 = vmatprep.subr.bf16.mxu1 %v4064_v28  ;;  %v4088_v28 = vpack.c.bf16 %v2037_v20, %v2034_v19 }
 0xa31   : > { %4051 = vmatpush3.bf16.msra.mxu0 %v4050_v27  ;;  %v2004_v27 = vld [vmem:[#allocation5 + $0x1b8] sm:$0xff]  ;;  %4067 = vmatpush1.bf16.msra.mxu1 %v4066_v25  ;;  %v2038_v25 = vld [vmem:[#allocation5 + $0x2c8] sm:$0xff] }
 0xa32   : > { %4053 = vmatprep.subr.bf16.mxu0 %v4052_v29  ;;  %v2007_v29 = vld [vmem:[#allocation5 + $0x1d0] sm:$0xff] }
 0xa33   : > { %v4068_v31 = vpack.c.bf16 %v2007_v29, %v2004_v27  ;;  %v2043_v27 = vld [vmem:[#allocation5 + $0x2f0] sm:$0xff]  ;;  %v4090_v29 = vpack.c.bf16 %v2036_v23, %v2033_v22 }
 0xa35   : > { %4055 = vmatpush3.bf16.msra.mxu0 %v4054_v35  ;;  %v4070_v35 = vpack.c.bf16 %v2006_v32, %v2003_v30  ;;  %4069 = vmatprep.subr.bf16.mxu1 %v4068_v31  ;;  %v4115_v30 = vpack.c.bf16 %v2038_v25, %v2035_v24  ;;  %v2039_v32 = vld [vmem:[#allocation5 + $0x2d0] sm:$0xff] }
 0xa36   : > { %4057 = vmatprep.subr.bf16.mxu0 %v4056_v36 }
 0xa37   : > { %4071 = vmatpush1.bf16.msra.mxu1 %v4070_v35  ;;  %v2044_v35 = vld [vmem:[#allocation5 + $0x2f8] sm:$0xff] }
 0xa38   : > { %4073 = vmatprep.subr.bf16.mxu1 %v4072_v40 }
 0xa39   : > { %4059 = vmatpush3.bf16.msra.mxu0 %v4058_v41  ;;  %v2012_v41 = vld [vmem:[#allocation5 + $0x1f8] sm:$0xff] }
 0xa3a   : > { %4061 = vmatprep.subr.bf16.mxu0 %v4060_v42  ;;  %v2011_v42 = vld [vmem:[#allocation5 + $0x1f0] sm:$0xff]  ;;  %v4074_v44 = vpack.c.bf16 %v2012_v41, %v2009_v39 }
 0xa3c   : > { %4075 = vmatpush1.bf16.msra.mxu1 %v4074_v44  ;;  %v3428_v44 = vld [vmem:[%s5219_s5 + $0x1] ss:$0 sm:$0xff] }
 0xa3d   : > { %4063 = vmatpush3.bf16.msra.mxu0 %v4062_v45  ;;  %v4103_v45 = vpack.c.bf16 %v2014_v43, %v2011_v42  ;;  %v3427_v42 = vld [vmem:[%s5218_s4 + $0x1] ss:$0 sm:$0xff] }
 0xa3e   : > { %4096 = vmatprep.subr.bf16.mxu0 %v4591_v1 }
 0xb00   : > { %v1833_v50 = vpop.f32.mrb[18].mxu1 }
 0xb01   : > { %v1834_v51 = vadd.f32 %v1833_v50, %v1760_v48  ;;  %v1835_v53 = vpop.f32.mrb[19].mxu1 }
 0xb02   : > { %v1836_v54 = vadd.f32 %v1835_v53, %v1764_v49  ;;  %v2019_v53 = vld [vmem:[#allocation5 + $0x230] sm:$0xff] }
 0xb03   : > { %v1838_v55 = vmul.f32 %v1834_v51, %v1834_v51 }
 0xb04   : > { %v1839_v56 = vmul.f32 %v1836_v54, %v1836_v54 }
 0xb05   : > { %v1840_v57 = vmul.f32 %v1838_v55, %v1834_v51  ;;  %v2015_v55 = vld [vmem:[#allocation5 + $0x210] sm:$0xff] }
 0xb06   : > { %v1841_v58 = vmul.f32 %v1839_v56, %v1836_v54  ;;  %v2018_v56 = vld [vmem:[#allocation5 + $0x228] sm:$0xff] }
 0xb07   : > { %v1842_v59 = vmul.f32 0.044715, %v1840_v57  ;;  %v2017_v57 = vld [vmem:[#allocation5 + $0x220] sm:$0xff] }
 0xb08   : > { %v1843_v60 = vmul.f32 0.044715, %v1841_v58  ;;  %v4078_v58 = vpack.c.bf16 %v2018_v56, %v2015_v55 }
 0xb09   : > { %v1844_v61 = vadd.f32 %v1842_v59, %v1834_v51  ;;  %v2020_v59 = vld [vmem:[#allocation5 + $0x238] sm:$0xff] }
 0xb0a   : > { %v1845_v63 = vadd.f32 %v1843_v60, %v1836_v54  ;;  %v4106_v60 = vpack.c.bf16 %v2020_v59, %v2017_v57 }
 0xb0b   : > { %v1846_v0 = vmul.f32 0.7978846, %v1844_v61  ;;  %v2022_v61 = vld [vmem:[#allocation5 + $0x248] sm:$0xff] }
 0xb0c   : > { %v1847_v2 = vmul.f32 0.7978846, %v1845_v63  ;;  %v2025_v63 = vld [vmem:[#allocation5 + $0x260] sm:$0xff] }
 0xb0d   : > { %4333 = vtanh.f32 %v1846_v0  ;;  %v4080_v0 = vpack.c.bf16 %v2025_v63, %v2022_v61 }
 0xb0e   : > { %4335 = vtanh.f32 %v1847_v2  ;;  %v2021_v2 = vld [vmem:[#allocation5 + $0x240] sm:$0xff] }
 0xb17   : > { %v4334_v3 = vpop.eup %4333 }
 0xb18   : > { %v4336_v4 = vpop.eup %4335  ;;  %v1850_v34 = vadd.f32 1.0, %v4334_v3  ;;  %v2024_v3 = vld [vmem:[#allocation5 + $0x258] sm:$0xff] }
 0xb19   : > { %v1851_v62 = vadd.f32 1.0, %v4336_v4  ;;  %v2023_v4 = vld [vmem:[#allocation5 + $0x250] sm:$0xff] }
 0xb1a   : > { %v1852_v5 = vmul.f32 0.5, %v1850_v34  ;;  %v4082_v34 = vpack.c.bf16 %v2024_v3, %v2021_v2 }
 0xb1b   : > { %v1853_v6 = vmul.f32 0.5, %v1851_v62  ;;  %v2026_v62 = vld [vmem:[#allocation5 + $0x268] sm:$0xff] }
 0xb1c   : > { %v1854_v9 = vmul.f32 %v1852_v5, %v1834_v51  ;;  %v2016_v51 = vld [vmem:[#allocation5 + $0x218] sm:$0xff] }
 0xb1d   : > { %v1855_v8 = vmul.f32 %v1853_v6, %v1836_v54  ;;  %v4076_v54 = vpack.c.bf16 %v2019_v53, %v2016_v51  ;;  %v2028_v5 = vld [vmem:[#allocation5 + $0x278] sm:$0xff]  ;;  %v2031_v6 = vld [vmem:[#allocation5 + $0x290] sm:$0xff] }
 0xb1f   : > { %1952 = vmatprep.mubr.f32.mxu0 %v1855_v8  ;;  %4077 = vmatprep.subr.bf16.mxu1 %v4076_v54  ;;  %v4109_v8 = vpack.c.bf16 %v2026_v62, %v2023_v4 }
 0xb20   : > { %1953 = vmatmul.mubr.f32.vlgmr.msra.gmra.mrb[6].mxu0 %v1854_v9  ;;  %4079 = vmatpush1.bf16.msra.mxu1 %v4078_v58  ;;  %v4084_v9 = vpack.c.bf16 %v2031_v6, %v2028_v5 }
 0xb21   : > { %3818 = vmatprep.mubr.msk.f32.mxu0 %vm4592_vm0, %v4593_v7  ;;  %4098 = vmatpush3.bf16.msra.mxu0 %v4097_v26  ;;  %v2040_v26 = vld [vmem:[#allocation5 + $0x2d8] sm:$0xff] }
 0xb22   : > { %4099 = vmatprep.subr.bf16.mxu0 %v4591_v1  ;;  %4081 = vmatprep.subr.bf16.mxu1 %v4080_v0  ;;  %v4092_v31 = vpack.c.bf16 %v2043_v27, %v2040_v26 }
 0xb24   : > { %4083 = vmatpush1.bf16.msra.mxu1 %v4082_v34 }
 0xb25   : > { %4085 = vmatprep.subr.bf16.mxu1 %v4084_v9 }
 0xbf3   : > { %v3553_v10 = vpop.f32.mrb[6].mxu0 }
 0xbf4   : > { %v3554_v12 = vpop.f32.mrb[7].mxu0 }
 0xbf5   : > { %v3555_v15 = vadd.f32 %v3554_v12, %v3553_v10  ;;  %v2027_v10 = vld [vmem:[#allocation5 + $0x270] sm:$0xff]  ;;  %v2030_v12 = vld [vmem:[#allocation5 + $0x288] sm:$0xff] }
 0xbf7   : > { %v1958_v17 = vadd.f32 %v3555_v15, %v5013_v52  ;;  %v2005_v52 = vld [vmem:[#allocation5 + $0x1c0] sm:$0xff] }
 0xbf8   : > { %v4100_v36 = vpack.c.bf16 %v2008_v33, %v2005_v52  ;;  %v2029_v15 = vld [vmem:[#allocation5 + $0x280] sm:$0xff]  ;;  %v2042_v52 = vld [vmem:[#allocation5 + $0x2e8] sm:$0xff] }
 0xbf9   : > { %v5038_v18 = vadd.f32 %v3424_v16, %v1958_v17  ;;  %v4086_v16 = vpack.c.bf16 %v2030_v12, %v2027_v10  ;;  %v2032_v17 = vld [vmem:[#allocation5 + $0x298] sm:$0xff]  ;;  %v2041_v33 = vld [vmem:[#allocation5 + $0x2e0] sm:$0xff] }
 0xbfa   : > { %4101 = vmatpush3.bf16.msra.mxu0 %v4100_v36  ;;  %v4112_v21 = vpack.c.bf16 %v2032_v17, %v2029_v15  ;;  %v4094_v36 = vpack.c.bf16 %v2042_v52, %v2039_v32  ;;  %v4118_v37 = vpack.c.bf16 %v2044_v35, %v2041_v33 }
 0xbfb   : > { %1971 = vadd.xlane.f32.xlu0 %v5038_v18  ;;  %4102 = vmatprep.subr.bf16.mxu0 %v4591_v1 }
 0xbfc   : > { %4087 = vmatpush1.bf16.msra.mxu1 %v4086_v16 }
 0xbfd   : > { %4089 = vmatprep.subr.bf16.mxu1 %v4088_v28 }
 0xbfe   : > { %4104 = vmatpush3.bf16.msra.mxu0 %v4103_v45 }
 0xbff   : > { %4105 = vmatprep.subr.bf16.mxu0 %v4591_v1 }
 0xc00   : > { %4091 = vmatpush1.bf16.msra.mxu1 %v4090_v29 }
 0xc01   : > { %4093 = vmatprep.subr.bf16.mxu1 %v4092_v31 }
 0xc02   : > { %4107 = vmatpush3.bf16.msra.mxu0 %v4106_v60 }
 0xc03   : > { %4108 = vmatprep.subr.bf16.mxu0 %v4591_v1 }
 0xc04   : > { %4095 = vmatpush1.bf16.msra.mxu1 %v4094_v36 }
 0xc05   : > { %3821 = vmatprep.subr.mxu1 %v4593_v7 }
 0xc06   : > { %4110 = vmatpush3.bf16.msra.mxu0 %v4109_v8 }
 0xc07   : > { %4111 = vmatprep.subr.bf16.mxu0 %v4591_v1 }
 0xc0a   : > { %4113 = vmatpush3.bf16.msra.mxu0 %v4112_v21 }
 0xc0b   : > { %4114 = vmatprep.subr.bf16.mxu0 %v4591_v1 }
 0xc0e   : > { %4116 = vmatpush3.bf16.msra.mxu0 %v4115_v30 }
 0xc0f   : > { %4117 = vmatprep.subr.bf16.mxu0 %v4591_v1 }
 0xc12   : > { %4119 = vmatpush3.bf16.msra.mxu0 %v4118_v37 }
 0xc13   : > { %4120 = vmatprep.subr.bf16.mxu0 %v4591_v1 }
 0xc88   : > { %v1972_v46 = vpop.xlane.xlu0 %1971 }
 0xc89   : > { %v1973_v48 = vmul.f32 0.0078125, %v1972_v46 }
 0xc8b   : > { %v5045_v49 = vsub.f32 %v5038_v18, %v1973_v48 }
 0xc8d   : > { %v1975_v50 = vmul.f32 %v5045_v49, %v5045_v49 }
 0xc8f   : > { %1976 = vadd.xlane.f32.xlu1 %v1975_v50 }
 0xd1c   : > { %v1977_v38 = vpop.xlane.xlu1 %1976 }
 0xd1d   : > { %v1978_v39 = vmul.f32 0.0078125, %v1977_v38 }
 0xd1f   : > { %v1979_v40 = vadd.f32 1e-05, %v1978_v39 }
 0xd21   : > { %4337 = vrsqrt.f32 %v1979_v40 }
 0xd2b   : > { %v4338_v41 = vpop.eup %4337 }
 0xd2c   : > { %v1981_v43 = vmul.f32 %v4338_v41, %v5045_v49 }
 0xd2e   : > { %v1988_v45 = vmul.f32 %v3427_v42, %v1981_v43 }
 0xd30   : > { %v1995_v46 = vadd.f32 %v3428_v44, %v1988_v45 }
 0xd32   : > { %2110 = vmatmul.mubr.f32.vlgmr.msra.gmra.mrb[20].mxu1 %v1995_v46  ;;  %3819 = vmatmul.mubr.f32.vlgmr.msra.gmra.mrb[8].mxu0 %v1995_v46 }
 0xd33   : > { %3823 = vmatprep.mubr.msk.f32.mxu1 %vm4592_vm0, %v4593_v7  ;;  %3893 = vmatprep.mubr.msk.f32.mxu0 %vm4592_vm0, %v4593_v7 }
 0xe05   : > { %v2111_v48 = vpop.f32.mrb[20].mxu1  ;;  %v5066_v50 = vpop.f32.mrb[8].mxu0 }
 0xe06   : > { %v3820_v51 = vpop.f32.mrb[9].mxu0  ;;  %2187 = vrot.lane.b32.xlu1 %v2111_v48, %s4596_s17  ;;  %v2113_v49 = vpop.f32.mrb[21].mxu1 }
 0xe07   : > { %2194 = vrot.lane.b32.xlu0 %v2113_v49, %s4596_s17  ;;  %3822 = vmatpush3.xpose.msk.msra.mxu1 %vm944_vm2, %v2113_v49 }
 0xe08   : > { %3826 = vmatprep.subr.mxu1 %v4593_v7 }
 0xe0a   : > { %2196 = vrot.lane.b32.xlu1 %v2113_v49, %s4597_s28  ;;  %3824 = vmatmul.mubr.msk.f32.vlgmr.msra.gmra.mrb[22].mxu1 %vm944_vm2, %v2111_v48 }
 0xe0b   : > { %2189 = vrot.lane.b32.xlu0 %v2111_v48, %s4597_s28  ;;  %3828 = vmatprep.mubr.msk.f32.mxu1 %vm4592_vm0, %v4593_v7 }
 0xe0e   : > { %2198 = vrot.lane.b32.xlu1 %v2113_v49, %s4595_s24 }
 0xe0f   : > { %2191 = vrot.lane.b32.xlu0 %v2111_v48, %s4595_s24 }
 0xe78   : > { %v2188_v53 = vpop.permute.xlu1 %2187 }
 0xe79   : > { %v2195_v54 = vpop.permute.xlu0 %2194 }
 0xe7a   : > { %3827 = vmatpush3.xpose.msk.msra.mxu1 %vm944_vm2, %v2195_v54 }
 0xe7b   : > { %3831 = vmatprep.subr.mxu1 %v4593_v7 }
 0xe7c   : > { %v2197_v55 = vpop.permute.xlu1 %2196 }
 0xe7d   : > { %3829 = vmatmul.mubr.msk.f32.vlgmr.msra.gmra.mrb[24].mxu1 %vm944_vm2, %v2188_v53  ;;  %v2190_v56 = vpop.permute.xlu0 %2189 }
 0xe7e   : > { %3832 = vmatpush3.xpose.msk.msra.mxu1 %vm944_vm2, %v2197_v55  ;;  %3833 = vmatprep.mubr.msk.f32.mxu1 %vm4592_vm0, %v4593_v7 }
 0xe7f   : > { %3836 = vmatprep.subr.mxu1 %v4593_v7 }
 0xe80   : > { %v2199_v57 = vpop.permute.xlu1 %2198 }
 0xe81   : > { %3834 = vmatmul.mubr.msk.f32.vlgmr.msra.gmra.mrb[26].mxu1 %vm944_vm2, %v2190_v56  ;;  %v2192_v58 = vpop.permute.xlu0 %2191 }
 0xe82   : > { %3837 = vmatpush3.xpose.msk.msra.mxu1 %vm944_vm2, %v2199_v57  ;;  %3838 = vmatprep.mubr.msk.f32.mxu1 %vm4592_vm0, %v4593_v7 }
 0xe83   : > { %3841 = vmatprep.subr.mxu1 %v4593_v7 }
 0xe85   : > { %3839 = vmatmul.mubr.msk.f32.vlgmr.msra.gmra.mrb[28].mxu1 %vm944_vm2, %v2192_v58  ;;  %v2866_v58 = vld [vmem:[#allocation7 + $0x80] sm:$0xff] }
 0xe86   : > { %3842 = vmatpush3.msra.mxu1 %v5066_v50  ;;  %3843 = vmatprep.mubr.msk.f32.mxu1 %vm4592_vm0, %v4593_v7 }
 0xe87   : > { %3846 = vmatprep.subr.mxu1 %v4593_v7 }
 0xedd   : > { %v2280_v59 = vpop.f32.mrb[22].mxu1 }
 0xede   : > { %v2506_v60 = vmul.f32 0.17677669, %v2280_v59  ;;  %v3825_v61 = vpop.f32.mrb[23].mxu1  ;;  %v2867_v59 = vld [vmem:[#allocation7 + $0x88] sm:$0xff] }
 0xedf   : > { %v4121_v61 = vpack.c.bf16 %v2867_v59, %v2866_v58  ;;  %v2996_v58 = vld [vmem:[#allocation8 + $0x168] sm:$0xff]  ;;  %v2998_v59 = vld [vmem:[#allocation8 + $0x178] sm:$0xff] }
 0xee0   : > { %v2510_v63 = vadd.f32 %v2506_v60, %v4966_v14  ;;  %v2868_v60 = vld [vmem:[#allocation7 + $0x90] sm:$0xff] }
 0xee1   : > { %4122 = vmatpush3.bf16.msra.mxu0 %v4121_v61  ;;  %v2995_v61 = vld [vmem:[#allocation8 + $0x160] sm:$0xff] }
 0xee2   : > { %v2514_v0 = vsel %vm1255_vm3, %v2510_v63, -inf  ;;  %4123 = vmatprep.subr.bf16.mxu0 %v4591_v1 }
 0xee3   : > { %2515 = vmax.xlane.f32.xlu1 %v2514_v0 }
 0xf50   : > { %v2354_v2 = vpop.f32.mrb[24].mxu1 }
 0xf51   : > { %v2507_v3 = vmul.f32 0.17677669, %v2354_v2  ;;  %v3830_v4 = vpop.f32.mrb[25].mxu1  ;;  %v2870_v2 = vld [vmem:[#allocation7 + $0xa0] sm:$0xff] }
 0xf53   : > { %v2511_v34 = vadd.f32 %v2507_v3, %v4966_v14  ;;  %v2871_v3 = vld [vmem:[#allocation7 + $0xa8] sm:$0xff] }
 0xf54   : > { %v2428_v62 = vpop.f32.mrb[26].mxu1  ;;  %v4127_v4 = vpack.c.bf16 %v2871_v3, %v2870_v2  ;;  %v3000_v2 = vld [vmem:[#allocation8 + $0x188] sm:$0xff]  ;;  %v3002_v3 = vld [vmem:[#allocation8 + $0x198] sm:$0xff] }
 0xf55   : > { %v2508_v5 = vmul.f32 0.17677669, %v2428_v62  ;;  %v3835_v6 = vpop.f32.mrb[27].mxu1  ;;  %v2517_v8 = vsel %vm1255_vm3, %v2511_v34, -inf  ;;  %v2872_v62 = vld [vmem:[#allocation7 + $0xb0] sm:$0xff] }
 0xf56   : > { %2518 = vmax.xlane.f32.xlu0 %v2517_v8 }
 0xf57   : > { %v2512_v9 = vadd.f32 %v2508_v5, %v4966_v14 }
 0xf58   : > { %v2502_v10 = vpop.f32.mrb[28].mxu1 }
 0xf59   : > { %v2509_v12 = vmul.f32 0.17677669, %v2502_v10  ;;  %v3840_v15 = vpop.f32.mrb[29].mxu1  ;;  %v2520_v16 = vsel %vm1255_vm3, %v2512_v9, -inf  ;;  %v2875_v10 = vld [vmem:[#allocation7 + $0xc8] sm:$0xff] }
 0xf5a   : > { %2521 = vmax.xlane.f32.xlu0 %v2520_v16  ;;  %v2876_v16 = vld [vmem:[#allocation7 + $0xd0] sm:$0xff] }
 0xf5b   : > { %v2513_v17 = vadd.f32 %v2509_v12, %v4966_v14 }
 0xf5d   : > { %v2523_v19 = vsel %vm1255_vm3, %v2513_v17, -inf }
 0xf5e   : > { %2524 = vmax.xlane.f32.xlu1 %v2523_v19 }
 0xf70   : > { %v2516_v20 = vpop.xlane.xlu1 %2515 }
 0xf71   : > { %v2526_v21 = vsub.f32 %v2510_v63, %v2516_v20  ;;  %v2869_v63 = vld [vmem:[#allocation7 + $0x98] sm:$0xff]  ;;  %v2878_v20 = vld [vmem:[#allocation7 + $0xe0] sm:$0xff] }
 0xf72   : > { %v4124_v0 = vpack.c.bf16 %v2869_v63, %v2868_v60  ;;  %v4156_v60 = vpack.c.bf16 %v2998_v59, %v2996_v58  ;;  %v2997_v63 = vld [vmem:[#allocation8 + $0x170] sm:$0xff]  ;;  %v3125_v59 = vld [vmem:[#allocation10 + $0x138] sm:$0xff] }
 0xf73   : > { %v2530_v28 = vmul.f32 1.442695, %v2526_v21  ;;  %v2879_v21 = vld [vmem:[#allocation7 + $0xe8] sm:$0xff]  ;;  %v3124_v58 = vld [vmem:[#allocation10 + $0x130] sm:$0xff] }
 0xf74   : > { %4125 = vmatpush3.bf16.msra.mxu0 %v4124_v0  ;;  %v4158_v0 = vpack.c.bf16 %v2997_v63, %v2995_v61  ;;  %v3142_v61 = vld [vmem:[#allocation10 + $0x1c0] sm:$0xff]  ;;  %v3143_v63 = vld [vmem:[#allocation10 + $0x1c8] sm:$0xff] }
 0xf75   : > { %4339 = vpow2.f32 %v2530_v28  ;;  %4126 = vmatprep.subr.bf16.mxu0 %v4591_v1  ;;  %v4139_v28 = vpack.c.bf16 %v2879_v21, %v2878_v20  ;;  %v3009_v20 = vld [vmem:[#allocation8 + $0x1d0] sm:$0xff]  ;;  %v3012_v21 = vld [vmem:[#allocation8 + $0x1e8] sm:$0xff] }
 0xf78   : > { %4128 = vmatpush3.bf16.msra.mxu0 %v4127_v4  ;;  %v4160_v4 = vpack.c.bf16 %v3002_v3, %v3000_v2  ;;  %v4192_v2 = vpack.c.bf16 %v3143_v63, %v3142_v61  ;;  %v3127_v3 = vld [vmem:[#allocation10 + $0x148] sm:$0xff]  ;;  %v3449_v63 = vld [vmem:[%s5276_s6] ss:$0 sm:$0xff] }
 0xf79   : > { %4129 = vmatprep.subr.bf16.mxu0 %v4591_v1 }
 0xf7f   : > { %v4340_v22 = vpop.eup %4339 }
 0xf80   : > { %v2538_v23 = vsel %vm1255_vm3, %v4340_v22, 0.0 }
 0xf81   : > { %2539 = vadd.xlane.f32.xlu0 %v2538_v23  ;;  %v2881_v23 = vld [vmem:[#allocation7 + $0xf8] sm:$0xff] }
 0xfe3   : > { %v2519_v24 = vpop.xlane.xlu0 %2518 }
 0xfe4   : > { %v2527_v25 = vsub.f32 %v2511_v34, %v2519_v24 }
 0xfe6   : > { %v2532_v26 = vmul.f32 1.442695, %v2527_v25 }
 0xfe7   : > { %v2522_v27 = vpop.xlane.xlu0 %2521 }
 0xfe8   : > { %4341 = vpow2.f32 %v2532_v26  ;;  %v2528_v29 = vsub.f32 %v2512_v9, %v2522_v27  ;;  %v2874_v9 = vld [vmem:[#allocation7 + $0xc0] sm:$0xff] }
 0xfe9   : > { %v4133_v15 = vpack.c.bf16 %v2875_v10, %v2874_v9  ;;  %v3005_v9 = vld [vmem:[#allocation8 + $0x1b0] sm:$0xff] }
 0xfea   : > { %v2534_v30 = vmul.f32 1.442695, %v2528_v29 }
 0xfeb   : > { %v2525_v35 = vpop.xlane.xlu1 %2524 }
 0xfec   : > { %4343 = vpow2.f32 %v2534_v30  ;;  %v2529_v36 = vsub.f32 %v2513_v17, %v2525_v35  ;;  %v2877_v17 = vld [vmem:[#allocation7 + $0xd8] sm:$0xff]  ;;  %v2984_v35 = vld [vmem:[#allocation8 + $0x108] sm:$0xff] }
 0xfed   : > { %v4136_v19 = vpack.c.bf16 %v2877_v17, %v2876_v16 }
 0xfee   : > { %v2536_v37 = vmul.f32 1.442695, %v2529_v36  ;;  %v2986_v36 = vld [vmem:[#allocation8 + $0x118] sm:$0xff] }
 0xff2   : > { %v4342_v14 = vpop.eup %4341 }
 0xff3   : > { %v2541_v31 = vsel %vm1255_vm3, %v4342_v14, 0.0 }
 0xff4   : > { %2542 = vadd.xlane.f32.xlu1 %v2541_v31 }
 0xff6   : > { %v4344_v32 = vpop.eup %4343 }
 0xff7   : > { %v2544_v52 = vsel %vm1255_vm3, %v4344_v32, 0.0 }
 0xff8   : > { %2545 = vadd.xlane.f32.xlu0 %v2544_v52 }
0x1005   : > { %2204 = vrot.lane.b32.xlu1 %v5066_v50, %s4597_s28 }
0x100e   : > { %2201 = vrot.lane.b32.xlu0 %v5066_v50, %s4596_s17  ;;  %v2540_v33 = vpop.xlane.xlu0 %2539 }
0x100f   : > { %4345 = vrcp.f32 %v2540_v33 }
0x1010   : > { %4347 = vpow2.f32 %v2536_v37  ;;  %v2983_v37 = vld [vmem:[#allocation8 + $0x100] sm:$0xff] }
0x1019   : > { %v4346_v38 = vpop.eup %4345 }
0x101a   : > { %v2551_v39 = vmul.f32 %v4346_v38, %v4340_v22  ;;  %v4348_v40 = vpop.eup %4347  ;;  %v2880_v22 = vld [vmem:[#allocation7 + $0xf0] sm:$0xff]  ;;  %v4144_v38 = vpack.c.bf16 %v2986_v36, %v2984_v35  ;;  %v3134_v36 = vld [vmem:[#allocation10 + $0x180] sm:$0xff] }
0x101b   : > { %v2547_v41 = vsel %vm1255_vm3, %v4348_v40, 0.0  ;;  %v4142_v24 = vpack.c.bf16 %v2881_v23, %v2880_v22 }
0x101c   : > { %3844 = vmatmul.mubr.msk.f32.vlgmr.msra.gmra.mrb[30].mxu1 %vm1255_vm3, %v2551_v39  ;;  %v2985_v39 = vld [vmem:[#allocation8 + $0x110] sm:$0xff] }
0x101d   : > { %3848 = vmatprep.mubr.msk.f32.mxu1 %vm4592_vm0, %v4593_v7 }
0x1029   : > { %2548 = vadd.xlane.f32.xlu1 %v2547_v41  ;;  %v2990_v41 = vld [vmem:[#allocation8 + $0x138] sm:$0xff] }
0x103a   : > { %2207 = vrot.lane.b32.xlu1 %v5066_v50, %s4595_s24 }
0x1081   : > { %v2543_v42 = vpop.xlane.xlu1 %2542 }
0x1082   : > { %4349 = vrcp.f32 %v2543_v42  ;;  %v4146_v42 = vpack.c.bf16 %v2985_v39, %v2983_v37  ;;  %v3135_v37 = vld [vmem:[#allocation10 + $0x188] sm:$0xff]  ;;  %v3118_v39 = vld [vmem:[#allocation10 + $0x100] sm:$0xff] }
0x1085   : > { %v2546_v43 = vpop.xlane.xlu0 %2545  ;;  %v2205_v48 = vpop.permute.xlu1 %2204 }
0x1086   : > { %4351 = vrcp.f32 %v2546_v43 }
0x1089   : > { %v2202_v44 = vpop.permute.xlu0 %2201 }
0x108a   : > { %3847 = vmatpush3.msra.mxu1 %v2202_v44  ;;  %v2987_v44 = vld [vmem:[#allocation8 + $0x120] sm:$0xff] }
0x108b   : > { %3851 = vmatprep.subr.mxu1 %v4593_v7 }
0x108c   : > { %v4350_v45 = vpop.eup %4349 }
0x108d   : > { %v2553_v46 = vmul.f32 %v4350_v45, %v4342_v14  ;;  %v2989_v45 = vld [vmem:[#allocation8 + $0x130] sm:$0xff] }
0x108f   : > { %3849 = vmatmul.mubr.msk.f32.vlgmr.msra.gmra.mrb[32].mxu1 %vm1255_vm3, %v2553_v46  ;;  %v2992_v46 = vld [vmem:[#allocation8 + $0x148] sm:$0xff] }
0x1090   : > { %v4352_v51 = vpop.eup %4351  ;;  %3852 = vmatpush3.msra.mxu1 %v2205_v48  ;;  %3853 = vmatprep.mubr.msk.f32.mxu1 %vm4592_vm0, %v4593_v7  ;;  %v2994_v48 = vld [vmem:[#allocation8 + $0x158] sm:$0xff] }
0x1091   : > { %v2555_v49 = vmul.f32 %v4352_v51, %v4344_v32  ;;  %3856 = vmatprep.subr.mxu1 %v4593_v7  ;;  %v4152_v51 = vpack.c.bf16 %v2994_v48, %v2992_v46  ;;  %v3121_v46 = vld [vmem:[#allocation10 + $0x118] sm:$0xff] }
0x1093   : > { %3854 = vmatmul.mubr.msk.f32.vlgmr.msra.gmra.mrb[34].mxu1 %vm1255_vm3, %v2555_v49  ;;  %v2991_v49 = vld [vmem:[#allocation8 + $0x140] sm:$0xff] }
0x1094   : > { %3858 = vmatprep.mubr.msk.f32.mxu1 %vm4592_vm0, %v4593_v7 }
0x10b6   : > { %v2549_v50 = vpop.xlane.xlu1 %2548 }
0x10b7   : > { %4353 = vrcp.f32 %v2549_v50  ;;  %v2993_v50 = vld [vmem:[#allocation8 + $0x150] sm:$0xff] }
0x10ba   : > { %v2208_v53 = vpop.permute.xlu1 %2207 }
0x10bb   : > { %3857 = vmatpush3.msra.mxu1 %v2208_v53  ;;  %v4154_v53 = vpack.c.bf16 %v2993_v50, %v2991_v49  ;;  %v3122_v50 = vld [vmem:[#allocation10 + $0x120] sm:$0xff] }
0x10bc   : > { %4145 = vmatprep.subr.bf16.mxu1 %v4144_v38  ;;  %v4176_v38 = vpack.c.bf16 %v3135_v37, %v3134_v36 }
0x10c1   : > { %v4354_v54 = vpop.eup %4353 }
0x10c2   : > { %v2557_v55 = vmul.f32 %v4354_v54, %v4348_v40  ;;  %v2988_v40 = vld [vmem:[#allocation8 + $0x128] sm:$0xff] }
0x10c3   : > { %v4148_v43 = vpack.c.bf16 %v2990_v41, %v2988_v40  ;;  %v3119_v40 = vld [vmem:[#allocation10 + $0x108] sm:$0xff] }
0x10c4   : > { %3859 = vmatmul.mubr.msk.f32.vlgmr.msra.gmra.mrb[36].mxu1 %vm1255_vm3, %v2557_v55  ;;  %v4178_v41 = vpack.c.bf16 %v3119_v40, %v3118_v39 }
0x10c5   : > { %3092 = vmatprep.mubr.f32.mxu1 %v4593_v7  ;;  %v2873_v7 = vld [vmem:[#allocation7 + $0xb8] sm:$0xff]  ;;  %4147 = vmatpush1.bf16.msra.mxu1 %v4146_v42  ;;  %v3136_v42 = vld [vmem:[#allocation10 + $0x190] sm:$0xff] }
0x10c6   : > { %v4130_v6 = vpack.c.bf16 %v2873_v7, %v2872_v62  ;;  %4149 = vmatprep.subr.bf16.mxu1 %v4148_v43  ;;  %v3001_v62 = vld [vmem:[#allocation8 + $0x190] sm:$0xff]  ;;  %v3004_v7 = vld [vmem:[#allocation8 + $0x1a8] sm:$0xff]  ;;  %v3137_v43 = vld [vmem:[#allocation10 + $0x198] sm:$0xff] }
0x10c8   : > { %4131 = vmatpush3.bf16.msra.mxu0 %v4130_v6  ;;  %v3006_v6 = vld [vmem:[#allocation8 + $0x1b8] sm:$0xff] }
0x10c9   : > { %4132 = vmatprep.subr.bf16.mxu0 %v4591_v1  ;;  %v4164_v10 = vpack.c.bf16 %v3006_v6, %v3004_v7  ;;  %v3129_v6 = vld [vmem:[#allocation10 + $0x158] sm:$0xff] }
0x10cc   : > { %4134 = vmatpush3.bf16.msra.mxu0 %v4133_v15  ;;  %v3010_v15 = vld [vmem:[#allocation8 + $0x1d8] sm:$0xff] }
0x10cd   : > { %4135 = vmatprep.subr.bf16.mxu0 %v4591_v1 }
0x10d0   : > { %4137 = vmatpush3.bf16.msra.mxu0 %v4136_v19  ;;  %v3007_v19 = vld [vmem:[#allocation8 + $0x1c0] sm:$0xff] }
0x10d1   : > { %4138 = vmatprep.subr.bf16.mxu0 %v4591_v1  ;;  %v4170_v22 = vpack.c.bf16 %v3009_v20, %v3007_v19  ;;  %v3149_v19 = vld [vmem:[#allocation10 + $0x1f8] sm:$0xff] }
0x10d4   : > { %4140 = vmatpush3.bf16.msra.mxu0 %v4139_v28  ;;  %v3014_v28 = vld [vmem:[#allocation8 + $0x1f8] sm:$0xff] }
0x10d5   : > { %4141 = vmatprep.subr.bf16.mxu0 %v4591_v1  ;;  %v4172_v23 = vpack.c.bf16 %v3014_v28, %v3012_v21  ;;  %v3132_v28 = vld [vmem:[#allocation10 + $0x170] sm:$0xff] }
0x10d8   : > { %4143 = vmatpush3.bf16.msra.mxu0 %v4142_v24  ;;  %v3011_v24 = vld [vmem:[#allocation8 + $0x1e0] sm:$0xff] }
0x10d9   : > { %4177 = vmatprep.subr.bf16.mxu0 %v4176_v38 }
0x10ef   : > { %v2627_v56 = vpop.f32.mrb[30].mxu1 }
0x10f0   : > { %v3845_v57 = vpop.f32.mrb[31].mxu1 }
0x1162   : > { %v2700_v34 = vpop.f32.mrb[32].mxu1 }
0x1163   : > { %2851 = vrot.lane.b32.xlu0 %v2700_v34, %s4595_s24  ;;  %v3850_v5 = vpop.f32.mrb[33].mxu1  ;;  %v2999_v34 = vld [vmem:[#allocation8 + $0x180] sm:$0xff]  ;;  %s3272_s24 = sshll.u32 %s596_s0, 4  ;;  %s5174_s24 = int_to_ptr.vmem [resolvable:$true] %s3272_s24 }
0x1164   : > { %v4162_v5 = vpack.c.bf16 %v3001_v62, %v2999_v34  ;;  %v3145_v34 = vld [vmem:[#allocation10 + $0x1d8] sm:$0xff]  ;;  %s4503_s18 = scalar_lea.vmem %s5174_s24, 128  ;;  %p4510_p8 = scmp.lt.s32.totalorder %s5174_s24, %s4508_s19 }
0x1165   : > { %p4504_p2 = scmp.ne.s32.totalorder %s5174_s24, %s4503_s18  ;;  %p4511_p11 = scmp.lt.s32.totalorder %s4509_s15, %s4503_s18 }
0x1166   : > { %v2773_v8 = vpop.f32.mrb[34].mxu1 }
0x1167   : > { %2855 = vrot.lane.b32.xlu1 %v2773_v8, %s4597_s28  ;;  %v3855_v12 = vpop.f32.mrb[35].mxu1  ;;  %v3003_v8 = vld [vmem:[#allocation8 + $0x1a0] sm:$0xff]  ;;  %p4505_p4 = pnand %p4504_p2, %p5279_p3  ;;  %p4512_p13 = por %p4511_p11, %p4510_p8 }
0x1168   : > { %v3008_v12 = vld [vmem:[#allocation8 + $0x1c8] sm:$0xff]  ;;  %v4166_v16 = vpack.c.bf16 %v3005_v9, %v3003_v8  ;;  %v3146_v8 = vld [vmem:[#allocation10 + $0x1e0] sm:$0xff] }
0x1169   : > { %v4168_v17 = vpack.c.bf16 %v3010_v15, %v3008_v12  ;;  %v3147_v9 = vld [vmem:[#allocation10 + $0x1e8] sm:$0xff]  ;;  %v3130_v15 = vld [vmem:[#allocation10 + $0x160] sm:$0xff]  ;;  %p4506_p7 = pneg %p4505_p4 }
0x116a   : > { %v4200_v12 = vpack.c.bf16 %v3147_v9, %v3146_v8 }
0x116b   : > { %p4513_p0 = pnand %p4512_p13, %p4506_p7 }
0x1197   : > { %v2846_v25 = vpop.f32.mrb[36].mxu1 }
0x1198   : > { %2859 = vrot.lane.b32.xlu0 %v2846_v25, %s4596_s17  ;;  %v3860_v26 = vpop.f32.mrb[37].mxu1  ;;  %v3013_v25 = vld [vmem:[#allocation8 + $0x1f0] sm:$0xff] }
0x1199   : > { %v4174_v26 = vpack.c.bf16 %v3013_v25, %v3011_v24  ;;  %v3445_v24 = vld [vmem:[%s5225_s11 + $0x2] sm:$0x3] }
0x119a   : > { %v3021_v25 = vrot.slane %v3445_v24, %v4963_v13 }
0x11d5   : > { %v2852_v27 = vpop.permute.xlu0 %2851 }
0x11d6   : > { %v2862_v30 = vsel %vm944_vm2, %v2627_v56, %v2852_v27 }
0x11d9   : > { %v2856_v29 = vpop.permute.xlu1 %2855 }
0x11da   : > { %v2863_v14 = vsel %vm1605_vm4, %v2862_v30, %v2856_v29 }
0x120a   : > { %v2860_v31 = vpop.permute.xlu0 %2859 }
0x120b   : > { %v2864_v32 = vsel %vm1607_vm5, %v2863_v14, %v2860_v31  ;;  %v3443_v31 = vld [vmem:[%s5222_s8 + $0x1] ss:$0 sm:$0xff] }
0x120c   : > { %3894 = vmatmul.mubr.f32.vlgmr.msra.gmra.mrb[10].mxu0 %v2864_v32 }
0x120d   : > { %4179 = vmatpush3.bf16.msra.mxu0 %v4178_v41 }
0x12df   : > { %v2948_v52 = vpop.f32.mrb[10].mxu0 }
0x12e0   : > { %v5141_v33 = vadd.f32 %v2948_v52, %v5038_v18  ;;  %v3895_v1 = vpop.f32.mrb[11].mxu0  ;;  %v4150_v18 = vpack.c.bf16 %v2989_v45, %v2987_v44  ;;  %v3444_v52 = vld [vmem:[%s5223_s9 + $0x1] ss:$0 sm:$0xff]  ;;  %v4180_v44 = vpack.c.bf16 %v3137_v43, %v3136_v42  ;;  %v3120_v45 = vld [vmem:[#allocation10 + $0x110] sm:$0xff] }
0x12e1   : > { %v4182_v48 = vpack.c.bf16 %v3121_v46, %v3120_v45 }
0x12e2   : > { %2957 = vadd.xlane.f32.xlu1 %v5141_v33  ;;  %4151 = vmatpush1.bf16.msra.mxu1 %v4150_v18  ;;  %v3138_v18 = vld [vmem:[#allocation10 + $0x1a0] sm:$0xff] }
0x12e3   : > { %4153 = vmatprep.subr.bf16.mxu1 %v4152_v51  ;;  %4181 = vmatprep.subr.bf16.mxu0 %v4180_v44  ;;  %v3139_v51 = vld [vmem:[#allocation10 + $0x1a8] sm:$0xff] }
0x12e4   : > { %4183 = vmatpush3.bf16.msra.mxu0 %v4182_v48  ;;  %v4184_v49 = vpack.c.bf16 %v3139_v51, %v3138_v18  ;;  %v3447_v51 = vld [vmem:[%s5227_s13 + $0x1] ss:$0 sm:$0xff] }
0x12e6   : > { %4155 = vmatpush1.bf16.msra.mxu1 %v4154_v53  ;;  %v3123_v53 = vld [vmem:[#allocation10 + $0x128] sm:$0xff]  ;;  %4185 = vmatprep.subr.bf16.mxu0 %v4184_v49 }
0x12e7   : > { %4157 = vmatprep.subr.bf16.mxu1 %v4156_v60  ;;  %v4190_v60 = vpack.c.bf16 %v3125_v59, %v3124_v58 }
0x12ea   : > { %4159 = vmatpush1.bf16.msra.mxu1 %v4158_v0  ;;  %v3126_v0 = vld [vmem:[#allocation10 + $0x140] sm:$0xff] }
0x12eb   : > { %4161 = vmatprep.subr.bf16.mxu1 %v4160_v4  ;;  %v3144_v4 = vld [vmem:[#allocation10 + $0x1d0] sm:$0xff]  ;;  %v4194_v62 = vpack.c.bf16 %v3127_v3, %v3126_v0 }
0x12ec   : > { %v4196_v7 = vpack.c.bf16 %v3145_v34, %v3144_v4 }
0x12ee   : > { %4163 = vmatpush1.bf16.msra.mxu1 %v4162_v5  ;;  %v3128_v5 = vld [vmem:[#allocation10 + $0x150] sm:$0xff] }
0x12ef   : > { %4165 = vmatprep.subr.bf16.mxu1 %v4164_v10  ;;  %v4198_v10 = vpack.c.bf16 %v3129_v6, %v3128_v5 }
0x12f2   : > { %4167 = vmatpush1.bf16.msra.mxu1 %v4166_v16  ;;  %v3131_v16 = vld [vmem:[#allocation10 + $0x168] sm:$0xff] }
0x12f3   : > { %4169 = vmatprep.subr.bf16.mxu1 %v4168_v17  ;;  %v3148_v17 = vld [vmem:[#allocation10 + $0x1f0] sm:$0xff]  ;;  %v4202_v20 = vpack.c.bf16 %v3131_v16, %v3130_v15 }
0x12f4   : > { %v4204_v21 = vpack.c.bf16 %v3149_v19, %v3148_v17 }
0x12f6   : > { %4171 = vmatpush1.bf16.msra.mxu1 %v4170_v22  ;;  %v3133_v22 = vld [vmem:[#allocation10 + $0x178] sm:$0xff] }
0x12f7   : > { %4173 = vmatprep.subr.bf16.mxu1 %v4172_v23  ;;  %v4206_v23 = vpack.c.bf16 %v3133_v22, %v3132_v28 }
0x12fa   : > { %4175 = vmatpush1.bf16.msra.mxu1 %v4174_v26  ;;  %v3025_v26 = vrot.slane %v3445_v24, %v1763_v47 }
0x136f   : > { %v2958_v54 = vpop.xlane.xlu1 %2957 }
0x1370   : > { %v2959_v55 = vmul.f32 0.0078125, %v2958_v54  ;;  %v4186_v54 = vpack.c.bf16 %v3123_v53, %v3122_v50 }
0x1372   : > { %v2960_v56 = vsub.f32 %v5141_v33, %v2959_v55  ;;  %4187 = vmatpush3.bf16.msra.mxu0 %v4186_v54  ;;  %v3140_v55 = vld [vmem:[#allocation10 + $0x1b0] sm:$0xff] }
0x1374   : > { %v2961_v57 = vmul.f32 %v2960_v56, %v2960_v56 }
0x1376   : > { %2962 = vadd.xlane.f32.xlu0 %v2961_v57 }
0x1403   : > { %v2963_v27 = vpop.xlane.xlu0 %2962 }
0x1404   : > { %v2964_v29 = vmul.f32 0.0078125, %v2963_v27 }
0x1406   : > { %v2965_v30 = vadd.f32 1e-05, %v2964_v29 }
0x1408   : > { %4355 = vrsqrt.f32 %v2965_v30 }
0x1412   : > { %v4356_v14 = vpop.eup %4355 }
0x1413   : > { %v2967_v32 = vmul.f32 %v4356_v14, %v2960_v56  ;;  %v3141_v56 = vld [vmem:[#allocation10 + $0x1b8] sm:$0xff] }
0x1414   : > { %v4188_v57 = vpack.c.bf16 %v3141_v56, %v3140_v55 }
0x1415   : > { %v2974_v1 = vmul.f32 %v3443_v31, %v2967_v32 }
0x1416   : > { %4189 = vmatprep.subr.bf16.mxu0 %v4188_v57 }
0x1417   : > { %v2981_v35 = vadd.f32 %v3444_v52, %v2974_v1  ;;  %4191 = vmatpush3.bf16.msra.mxu0 %v4190_v60 }
0x1418   : > { %4193 = vmatprep.subr.bf16.mxu0 %v4192_v2 }
0x1419   : > { %3093 = vmatmul.mubr.f32.vlgmr.msra.gmra.mrb[38].mxu1 %v2981_v35 }
0x141b   : > { %4195 = vmatpush3.bf16.msra.mxu0 %v4194_v62 }
0x141c   : > { %4197 = vmatprep.subr.bf16.mxu0 %v4196_v7 }
0x141f   : > { %4199 = vmatpush3.bf16.msra.mxu0 %v4198_v10 }
0x1420   : > { %4201 = vmatprep.subr.bf16.mxu0 %v4200_v12 }
0x1423   : > { %4203 = vmatpush3.bf16.msra.mxu0 %v4202_v20 }
0x1424   : > { %4205 = vmatprep.subr.bf16.mxu0 %v4204_v21 }
0x1427   : > { %4207 = vmatpush3.bf16.msra.mxu0 %v4206_v23 }
0x14ec   : > { %v3094_v27 = vpop.f32.mrb[38].mxu1 }
0x14ed   : > { %v3095_v29 = vadd.f32 %v3094_v27, %v3021_v25  ;;  %v3096_v30 = vpop.f32.mrb[39].mxu1 }
0x14ee   : > { %v3097_v14 = vadd.f32 %v3096_v30, %v3025_v26 }
0x14ef   : > { %v3099_v31 = vmul.f32 %v3095_v29, %v3095_v29 }
0x14f0   : > { %v3100_v32 = vmul.f32 %v3097_v14, %v3097_v14 }
0x14f1   : > { %v3101_v52 = vmul.f32 %v3099_v31, %v3095_v29 }
0x14f2   : > { %v3102_v1 = vmul.f32 %v3100_v32, %v3097_v14 }
0x14f3   : > { %v3103_v35 = vmul.f32 0.044715, %v3101_v52 }
0x14f4   : > { %v3104_v36 = vmul.f32 0.044715, %v3102_v1 }
0x14f5   : > { %v3105_v37 = vadd.f32 %v3103_v35, %v3095_v29 }
0x14f6   : > { %v3106_v38 = vadd.f32 %v3104_v36, %v3097_v14 }
0x14f7   : > { %v3107_v39 = vmul.f32 0.7978846, %v3105_v37 }
0x14f8   : > { %v3108_v40 = vmul.f32 0.7978846, %v3106_v38 }
0x14f9   : > { %4357 = vtanh.f32 %v3107_v39 }
0x14fa   : > { %4359 = vtanh.f32 %v3108_v40 }
0x1503   : > { %v4358_v13 = vpop.eup %4357 }
0x1504   : > { %v4360_v41 = vpop.eup %4359  ;;  %v3111_v11 = vadd.f32 1.0, %v4358_v13 }
0x1505   : > { %v3112_v47 = vadd.f32 1.0, %v4360_v41 }
0x1506   : > { %v3113_v42 = vmul.f32 0.5, %v3111_v11 }
0x1507   : > { %v3114_v43 = vmul.f32 0.5, %v3112_v47 }
0x1508   : > { %v3115_v45 = vmul.f32 %v3113_v42, %v3095_v29 }
0x1509   : > { %v3116_v44 = vmul.f32 %v3114_v43, %v3097_v14 }
0x150b   : > { %3214 = vmatprep.mubr.f32.mxu0 %v3116_v44 }
0x150c   : > { %3215 = vmatmul.mubr.f32.vlgmr.msra.gmra.mrb[12].mxu0 %v3115_v45 }
0x15df   : > { %v3638_v46 = vpop.f32.mrb[12].mxu0 }
0x15e0   : > { %v3639_v48 = vpop.f32.mrb[13].mxu0 }
0x15e1   : > { %v3640_v18 = vadd.f32 %v3639_v48, %v3638_v46 }
0x15e3   : > { %v3220_v49 = vadd.f32 %v3640_v18, %v5141_v33  ;;  %v3448_v33 = vld [vmem:[%s5275_s30] ss:$0 sm:$0xff] }
0x15e5   : > { %v3229_v50 = vadd.f32 %v3447_v51, %v3220_v49 }
0x15e7   : > { %3232 = vadd.xlane.f32.xlu0 %v3229_v50 }
0x1674   : > { %v3233_v53 = vpop.xlane.xlu0 %3232 }
0x1675   : > { %v3234_v54 = vmul.f32 0.0078125, %v3233_v53 }
0x1677   : > { %v3235_v55 = vsub.f32 %v3229_v50, %v3234_v54 }
0x1679   : > { %v3236_v56 = vmul.f32 %v3235_v55, %v3235_v55 }
0x167b   : > { %3237 = vadd.xlane.f32.xlu1 %v3236_v56 }
0x1708   : > { %v3238_v57 = vpop.xlane.xlu1 %3237 }
0x1709   : > { %v3239_v58 = vmul.f32 0.0078125, %v3238_v57 }
0x170b   : > { %v3240_v59 = vadd.f32 1e-05, %v3239_v58 }
0x170d   : > { %4361 = vrsqrt.f32 %v3240_v59 }
0x1717   : > { %v4362_v60 = vpop.eup %4361 }
0x1718   : > { %v3242_v61 = vmul.f32 %v4362_v60, %v3235_v55 }
0x171a   : > { %v3249_v0 = vmul.f32 %v3448_v33, %v3242_v61 }
0x171c   : > { %v3256_v2 = vadd.f32 %v3449_v63, %v3249_v0 }
0x171e   : > { %3257 = vst [vmem:[%s596_s0] sm:$0xff] %v3256_v2 }
0x171f   : > { %4516 = shalt.err (!%p4513_p0)
}
0x1720   : > { %s4517_s26 = scalar_lea.hbm %s5172_s21, 128  ;;  %s4521_s10 = scalar_lea.hbm %s5278_s20, 256 }
0x1721   : > { %p4518_p5 = scmp.ne.s32.totalorder %s5172_s21, %s4517_s26  ;;  %p4522_p10 = scmp.lt.u32.totalorder %s5172_s21, %s5278_s20 }
0x1722   : > { %p4523_p12 = scmp.lt.u32.totalorder %s4521_s10, %s4517_s26  ;;  %p4525_p2 = scmp.lt.u32.totalorder %s4517_s26, %s5172_s21 }
0x1723   : > { %p4519_p6 = pnand %p4518_p5, %p5279_p3 }
0x1724   : > { %p4524_p1 = por %p4523_p12, %p4522_p10 }
0x1725   : > { %p4520_p9 = pneg %p4519_p6 }
0x1726   : > { %p4526_p4 = por %p4525_p2, %p4524_p1 }
0x1728   : > { %p4527_p7 = pnand %p4526_p4, %p4520_p9 }
0x172a   : > { %4530 = shalt.err (!%p4527_p7)
}
0x172b   : > { %4228 = dma.vmem_to_hbm [thread:$0]  (%p5279_p3), %s5174_s24, 128, %s5172_s21, %s3259_s29  }
0x172c PF: > { %s5280_s16 = sld [smem:[#allocation19_spill]]  ;;  %s5281_s0 = sld [smem:[#allocation16_spill]] }
0x172d   : > { %s5282_s17 = sld [smem:[#allocation23_spill]] }
0x1732   : > { %p4260_p8 = scmp.ge.s32.totalorder %s5280_s16, 2  ;;  %s3284_s28 = sand.u32 1, %s5281_s0  }
0x1733   : > { %p5283_p11 = scmp.ne.s32.totalorder %s5282_s17, 0  ;;  %s3285_s23 = scalar_lea.sflag [#allocation4], %s3284_s28 }
0x1735   : > { %p4247_p13 = pnand %p4260_p8, %p5283_p11 }
0x1737   : > { %4560 = dma.done.wait (!%p4247_p13), %s3285_s23, 128  }
0x1738   : > { %4562 = vsyncadd (!%p4247_p13), %s3285_s23, 4294967168  ;;  %s5284_s24 = sld [smem:[#allocation20_spill]]  ;;  %s5285_s21 = sld [smem:[#allocation17_spill]] }
0x1739   : > { %s5286_s22 = sld [smem:[#allocation18_spill]]  ;;  %s5287_s23 = sld [smem:[#allocation21_spill]] }
0x173e   : > { %p29_p0 = scmp.ge.s32.totalorder %s5284_s24, 4  }
0x1740   :  { %31 = sbr.rel (!%p29_p0) target bundleno = 13 (0xd), region = 153 }
0x1747   :  { %3290 = vsyncpa [#allocation3], 1 }
0x1748   :  { %3292 = vsyncpa [#allocation3 + $0x1], 1 }
0x1749   :  { %3293 = vsyncpa [#allocation6], 1 }
0x174a   :  { %3294 = vsyncpa [#allocation9], 1 }
0x174b   :  { %3295 = vsyncpa [#allocation4], 1 }
0x174c   :  { %3297 = vsyncpa [#allocation4 + $0x1], 1 }

</bundles_post_ra>
